<compile_context>
chip_gen: v6e
topology: v6e:2x2x1
jax: 0.10.0
libtpu: 0.0.40
codegen_flags: <defaults>
</compile_context>

<pallas_src>
import functools

import jax
import jax.numpy as jnp
from jax.experimental import pallas as pl
from jax.experimental.pallas import tpu as pltpu


def _lstm_fc_kernel(x_ref,                       # (S*Bp, I)  time-major, batch-padded
                    wih0_ref, whh0_ref, b0_ref,  # layer-0 weights (pre-transposed, g-cols x2)
                    wih1_ref, whh1_ref, b1_ref,  # layer-1 weights (pre-transposed, g-cols x2)
                    fcw_ref, fcb_ref,            # final linear
                    out_ref,                     # (Bp, O)
                    gates_scr,                   # (S*Bp, 4H) scratch, reused by both layers
                    h1seq_scr,                   # (S*Bp, H)  layer-0 hidden sequence
                    *, seq_len, batch, hidden):
    S, Bp, H = seq_len, batch, hidden
    f32 = jnp.float32

    def run_layer(whh_T, out_seq_ref):
        # gates_scr already holds x_t @ W_ih^T + (b_ih + b_hh) for every step,
        # with the g-gate block pre-scaled by 2.
        h = jnp.zeros((Bp, H), f32)
        c = jnp.zeros((Bp, H), f32)
        # S is small & static: the Python loop unrolls into straight-line code
        # with static, sublane-aligned slices.
        for t in range(S):
            row = t * Bp
            gates = gates_scr[row:row + Bp, :] + jnp.dot(
                h, whh_T, preferred_element_type=f32)
            # Single full-tile EUP pass.  Because the g-gate pre-activation was
            # scaled by 2 on the host, tanh(g_pre) == 2*sigmoid(2*g_pre) - 1.
            sg = jax.nn.sigmoid(gates)
            i_g = sg[:, 0 * H:1 * H]
            f_g = sg[:, 1 * H:2 * H]
            g_g = 2.0 * sg[:, 2 * H:3 * H] - 1.0
            o_g = sg[:, 3 * H:4 * H]
            c = f_g * c + i_g * g_g
            h = o_g * jnp.tanh(c)
            if out_seq_ref is not None:
                out_seq_ref[row:row + Bp, :] = h   # off the critical path
        return h

    # ---- layer 0: batched input projection (one MXU matmul for all steps) ----
    gates_scr[...] = jnp.dot(x_ref[...], wih0_ref[...],
                             preferred_element_type=f32) + b0_ref[...]
    run_layer(whh0_ref[...], h1seq_scr)

    # ---- layer 1: batched input projection over the buffered h1 sequence ----
    gates_scr[...] = jnp.dot(h1seq_scr[...], wih1_ref[...],
                             preferred_element_type=f32) + b1_ref[...]
    h_last = run_layer(whh1_ref[...], None)

    # ---- final linear on the last timestep of the top layer ----
    out_ref[...] = jnp.dot(h_last, fcw_ref[...],
                           preferred_element_type=f32) + fcb_ref[...]


def _prescale_g_cols(w, H, axis):
    """Multiply the g-gate block (columns/rows [2H:3H] of the 4H axis) by 2."""
    idx = [slice(None)] * w.ndim
    idx[axis] = slice(2 * H, 3 * H)
    return w.at[tuple(idx)].multiply(2.0)


def lstm_fc_forward(x, params):
    """x: (batch, seq, input_size) float32 -> (batch, output_size) float32."""
    B, S, I = x.shape
    H = params["whh0_T"].shape[0]
    O = params["fcw_T"].shape[1]
    Bp = ((B + 7) // 8) * 8  # pad batch to a sublane multiple (free rows)

    # (B, S, I) -> (S, B, I) -> zero-pad batch -> (S*Bp, I): time-major rows so
    # each timestep's Bp rows form a contiguous, 8-aligned sublane slab.
    x_sb = jnp.transpose(x, (1, 0, 2))
    if Bp != B:
        x_sb = jnp.pad(x_sb, ((0, 0), (0, Bp - B), (0, 0)))
    x_flat = x_sb.reshape(S * Bp, I)

    # Host-side (cheap, tiny arrays): scale the g-gate block by 2 so the kernel
    # can recover tanh from the single sigmoid pass.
    wih0 = _prescale_g_cols(params["wih0_T"], H, axis=1)
    whh0 = _prescale_g_cols(params["whh0_T"], H, axis=1)
    b0 = _prescale_g_cols(params["b0"], H, axis=1)
    wih1 = _prescale_g_cols(params["wih1_T"], H, axis=1)
    whh1 = _prescale_g_cols(params["whh1_T"], H, axis=1)
    b1 = _prescale_g_cols(params["b1"], H, axis=1)

    kernel = functools.partial(_lstm_fc_kernel, seq_len=S, batch=Bp, hidden=H)
    vmem = pl.BlockSpec(memory_space=pltpu.MemorySpace.VMEM)

    out = pl.pallas_call(
        kernel,
        out_shape=jax.ShapeDtypeStruct((Bp, O), jnp.float32),
        in_specs=[vmem] * 9,
        out_specs=vmem,
        scratch_shapes=[
            pltpu.VMEM((S * Bp, 4 * H), jnp.float32),  # gate buffer (both layers)
            pltpu.VMEM((S * Bp, H), jnp.float32),      # layer-0 hidden sequence
        ],
    )(x_flat,
      wih0, whh0, b0,
      wih1, whh1, b1,
      params["fcw_T"], params["fcb"])

    return out[:B]


def make_params(key, input_size, hidden_size, output_size):
    """Deterministic PyTorch-style init: U(-1/sqrt(H), 1/sqrt(H))."""
    H = hidden_size
    bound = 1.0 / jnp.sqrt(jnp.float32(H))
    ks = jax.random.split(key, 12)
    u = lambda k, shape: jax.random.uniform(k, shape, jnp.float32, -bound, bound)
    # PyTorch LSTM stores W_ih (4H, in), W_hh (4H, H), b_ih (4H,), b_hh (4H,).
    wih0 = u(ks[0], (4 * H, input_size))
    whh0 = u(ks[1], (4 * H, H))
    b0 = u(ks[2], (4 * H,)) + u(ks[3], (4 * H,))       # b_ih + b_hh fused
    wih1 = u(ks[4], (4 * H, H))
    whh1 = u(ks[5], (4 * H, H))
    b1 = u(ks[6], (4 * H,)) + u(ks[7], (4 * H,))
    fcw = u(ks[8], (output_size, H))
    fcb = u(ks[9], (output_size,))
    return {
        "wih0_T": wih0.T, "whh0_T": whh0.T, "b0": b0.reshape(1, 4 * H),
        "wih1_T": wih1.T, "whh1_T": whh1.T, "b1": b1.reshape(1, 4 * H),
        "fcw_T": fcw.T, "fcb": fcb.reshape(1, output_size),
    }


def reference_forward(x, params):
    """Pure-JAX reference matching torch.nn.LSTM (i,f,g,o) + Linear."""
    B, S, I = x.shape
    H = params["whh0_T"].shape[0]

    def run_layer(inputs, wih_T, whh_T, b):
        def step(carry, x_t):
            h, c = carry
            gates = x_t @ wih_T + h @ whh_T + b
            i, f, g, o = jnp.split(gates, 4, axis=-1)
            i = jax.nn.sigmoid(i)
            f = jax.nn.sigmoid(f)
            g = jnp.tanh(g)
            o = jax.nn.sigmoid(o)
            c = f * c + i * g
            h = o * jnp.tanh(c)
            return (h, c), h
        init = (jnp.zeros((B, H), jnp.float32), jnp.zeros((B, H), jnp.float32))
        _, hs = jax.lax.scan(step, init, jnp.transpose(inputs, (1, 0, 2)))
        return jnp.transpose(hs, (1, 0, 2))

    h1_seq = run_layer(x, params["wih0_T"], params["whh0_T"], params["b0"])
    h2_seq = run_layer(h1_seq, params["wih1_T"], params["whh1_T"], params["b1"])
    return h2_seq[:, -1] @ params["fcw_T"] + params["fcb"]


if __name__ == "__main__":
    B, S, I, H, O = 2, 8, 16, 32, 1
    key = jax.random.PRNGKey(0)
    k_x, k_p = jax.random.split(key)
    x = jax.random.normal(k_x, (B, S, I), jnp.float32)
    params = make_params(k_p, I, H, O)

    out = lstm_fc_forward(x, params)
    out = jax.block_until_ready(out)

    ref = reference_forward(x, params)
    assert out.shape == (B, O)
    # Slightly looser atol than before: the kernel computes the g-gate tanh as
    # 2*sigmoid(2x)-1 (exact in real arithmetic, a few f32 ULPs away from the
    # reference's jnp.tanh); still 4+ orders of magnitude below the signal.
    assert jnp.allclose(out, ref, atol=5e-5, rtol=1e-5), (out, ref)
    print("KERNEL_OK")
</pallas_src>

<mosaic_0001>
module attributes {stable_mosaic.version = 11 : i64} {
  func.func @_lstm_fc_kernel(%arg0: memref<64x16xf32, #tpu.memory_space<vmem>>, %arg1: memref<16x128xf32, #tpu.memory_space<vmem>>, %arg2: memref<32x128xf32, #tpu.memory_space<vmem>>, %arg3: memref<1x128xf32, #tpu.memory_space<vmem>>, %arg4: memref<32x128xf32, #tpu.memory_space<vmem>>, %arg5: memref<32x128xf32, #tpu.memory_space<vmem>>, %arg6: memref<1x128xf32, #tpu.memory_space<vmem>>, %arg7: memref<32x1xf32, #tpu.memory_space<vmem>>, %arg8: memref<1x1xf32, #tpu.memory_space<vmem>>, %arg9: memref<8x1xf32, #tpu.memory_space<vmem>>, %arg10: memref<64x128xf32, #tpu.memory_space<vmem>>, %arg11: memref<64x32xf32, #tpu.memory_space<vmem>>) attributes {dimension_semantics = [], scalar_prefetch = 0 : i64, scratch_operands = 2 : i64, tpu.core_type = #tpu.core_type<tc>} {
    %c0 = arith.constant 0 : index
    %c0_0 = arith.constant 0 : index
    %0 = vector.load %arg0[%c0, %c0_0] : memref<64x16xf32, #tpu.memory_space<vmem>>, vector<64x16xf32>
    %c0_1 = arith.constant 0 : index
    %c0_2 = arith.constant 0 : index
    %1 = vector.load %arg1[%c0_1, %c0_2] : memref<16x128xf32, #tpu.memory_space<vmem>>, vector<16x128xf32>
    %cst = arith.constant dense<0.000000e+00> : vector<64x128xf32>
    %2 = tpu.matmul %0, %1, %cst {dimension_numbers = #tpu.dot_dimension_numbers<[1], [0], [0], [1], [0, 0, 1, 1], [], []>} : vector<64x16xf32>, vector<16x128xf32>, vector<64x128xf32> -> vector<64x128xf32>
    %c0_3 = arith.constant 0 : index
    %c0_4 = arith.constant 0 : index
    %3 = vector.load %arg3[%c0_3, %c0_4] : memref<1x128xf32, #tpu.memory_space<vmem>>, vector<1x128xf32>
    %4 = vector.broadcast %3 : vector<1x128xf32> to vector<64x128xf32>
    %5 = arith.addf %2, %4 : vector<64x128xf32>
    %c0_5 = arith.constant 0 : index
    %c0_6 = arith.constant 0 : index
    %6 = vector.load %arg10[%c0_5, %c0_6] : memref<64x128xf32, #tpu.memory_space<vmem>>, vector<64x128xf32>
    tpu.vector_store %arg10[%c0_5, %c0_6], %5 {strides = array<i32>} : memref<64x128xf32, #tpu.memory_space<vmem>>, vector<64x128xf32>,
    %c0_7 = arith.constant 0 : index
    %c0_8 = arith.constant 0 : index
    %7 = vector.load %arg2[%c0_7, %c0_8] : memref<32x128xf32, #tpu.memory_space<vmem>>, vector<32x128xf32>
    %cst_9 = arith.constant 0.000000e+00 : f32
    %8 = vector.broadcast %cst_9 : f32 to vector<8x32xf32>
    %cst_10 = arith.constant 0.000000e+00 : f32
    %9 = vector.broadcast %cst_10 : f32 to vector<8x32xf32>
    %c0_11 = arith.constant 0 : index
    %c0_12 = arith.constant 0 : index
    %10 = vector.load %arg10[%c0_11, %c0_12] : memref<64x128xf32, #tpu.memory_space<vmem>>, vector<8x128xf32>
    %cst_13 = arith.constant dense<0.000000e+00> : vector<8x128xf32>
    %11 = tpu.matmul %8, %7, %cst_13 {dimension_numbers = #tpu.dot_dimension_numbers<[1], [0], [0], [1], [0, 0, 1, 1], [], []>} : vector<8x32xf32>, vector<32x128xf32>, vector<8x128xf32> -> vector<8x128xf32>
    %12 = arith.addf %10, %11 : vector<8x128xf32>
    %13 = arith.negf %12 : vector<8x128xf32>
    %14 = math.exp %13 : vector<8x128xf32>
    %cst_14 = arith.constant 1.000000e+00 : f32
    %15 = vector.broadcast %cst_14 : f32 to vector<8x128xf32>
    %16 = arith.addf %15, %14 : vector<8x128xf32>
    %17 = arith.divf %15, %16 : vector<8x128xf32>
    %18 = vector.extract_strided_slice %17 {offsets = [0, 0], sizes = [8, 32], strides = [1, 1]} : vector<8x128xf32> to vector<8x32xf32>
    %19 = vector.extract_strided_slice %17 {offsets = [0, 32], sizes = [8, 32], strides = [1, 1]} : vector<8x128xf32> to vector<8x32xf32>
    %20 = vector.extract_strided_slice %17 {offsets = [0, 64], sizes = [8, 32], strides = [1, 1]} : vector<8x128xf32> to vector<8x32xf32>
    %cst_15 = arith.constant 2.000000e+00 : f32
    %21 = vector.broadcast %cst_15 : f32 to vector<8x32xf32>
    %22 = arith.mulf %21, %20 : vector<8x32xf32>
    %cst_16 = arith.constant 1.000000e+00 : f32
    %23 = vector.broadcast %cst_16 : f32 to vector<8x32xf32>
    %24 = arith.subf %22, %23 : vector<8x32xf32>
    %25 = vector.extract_strided_slice %17 {offsets = [0, 96], sizes = [8, 32], strides = [1, 1]} : vector<8x128xf32> to vector<8x32xf32>
    %26 = arith.mulf %19, %9 : vector<8x32xf32>
    %27 = arith.mulf %18, %24 : vector<8x32xf32>
    %28 = arith.addf %26, %27 : vector<8x32xf32>
    %29 = math.tanh %28 : vector<8x32xf32>
    %30 = arith.mulf %25, %29 : vector<8x32xf32>
    %c0_17 = arith.constant 0 : index
    %c0_18 = arith.constant 0 : index
    %31 = vector.load %arg11[%c0_17, %c0_18] : memref<64x32xf32, #tpu.memory_space<vmem>>, vector<8x32xf32>
    tpu.vector_store %arg11[%c0_17, %c0_18], %30 {strides = array<i32>} : memref<64x32xf32, #tpu.memory_space<vmem>>, vector<8x32xf32>,
    %c8 = arith.constant 8 : index
    %c0_19 = arith.constant 0 : index
    %32 = vector.load %arg10[%c8, %c0_19] : memref<64x128xf32, #tpu.memory_space<vmem>>, vector<8x128xf32>
    %cst_20 = arith.constant dense<0.000000e+00> : vector<8x128xf32>
    %33 = tpu.matmul %30, %7, %cst_20 {dimension_numbers = #tpu.dot_dimension_numbers<[1], [0], [0], [1], [0, 0, 1, 1], [], []>} : vector<8x32xf32>, vector<32x128xf32>, vector<8x128xf32> -> vector<8x128xf32>
    %34 = arith.addf %32, %33 : vector<8x128xf32>
    %35 = arith.negf %34 : vector<8x128xf32>
    %36 = math.exp %35 : vector<8x128xf32>
    %cst_21 = arith.constant 1.000000e+00 : f32
    %37 = vector.broadcast %cst_21 : f32 to vector<8x128xf32>
    %38 = arith.addf %37, %36 : vector<8x128xf32>
    %39 = arith.divf %37, %38 : vector<8x128xf32>
    %40 = vector.extract_strided_slice %39 {offsets = [0, 0], sizes = [8, 32], strides = [1, 1]} : vector<8x128xf32> to vector<8x32xf32>
    %41 = vector.extract_strided_slice %39 {offsets = [0, 32], sizes = [8, 32], strides = [1, 1]} : vector<8x128xf32> to vector<8x32xf32>
    %42 = vector.extract_strided_slice %39 {offsets = [0, 64], sizes = [8, 32], strides = [1, 1]} : vector<8x128xf32> to vector<8x32xf32>
    %cst_22 = arith.constant 2.000000e+00 : f32
    %43 = vector.broadcast %cst_22 : f32 to vector<8x32xf32>
    %44 = arith.mulf %43, %42 : vector<8x32xf32>
    %cst_23 = arith.constant 1.000000e+00 : f32
    %45 = vector.broadcast %cst_23 : f32 to vector<8x32xf32>
    %46 = arith.subf %44, %45 : vector<8x32xf32>
    %47 = vector.extract_strided_slice %39 {offsets = [0, 96], sizes = [8, 32], strides = [1, 1]} : vector<8x128xf32> to vector<8x32xf32>
    %48 = arith.mulf %41, %28 : vector<8x32xf32>
    %49 = arith.mulf %40, %46 : vector<8x32xf32>
    %50 = arith.addf %48, %49 : vector<8x32xf32>
    %51 = math.tanh %50 : vector<8x32xf32>
    %52 = arith.mulf %47, %51 : vector<8x32xf32>
    %c8_24 = arith.constant 8 : index
    %c0_25 = arith.constant 0 : index
    %53 = vector.load %arg11[%c8_24, %c0_25] : memref<64x32xf32, #tpu.memory_space<vmem>>, vector<8x32xf32>
    tpu.vector_store %arg11[%c8_24, %c0_25], %52 {strides = array<i32>} : memref<64x32xf32, #tpu.memory_space<vmem>>, vector<8x32xf32>,
    %c16 = arith.constant 16 : index
    %c0_26 = arith.constant 0 : index
    %54 = vector.load %arg10[%c16, %c0_26] : memref<64x128xf32, #tpu.memory_space<vmem>>, vector<8x128xf32>
    %cst_27 = arith.constant dense<0.000000e+00> : vector<8x128xf32>
    %55 = tpu.matmul %52, %7, %cst_27 {dimension_numbers = #tpu.dot_dimension_numbers<[1], [0], [0], [1], [0, 0, 1, 1], [], []>} : vector<8x32xf32>, vector<32x128xf32>, vector<8x128xf32> -> vector<8x128xf32>
    %56 = arith.addf %54, %55 : vector<8x128xf32>
    %57 = arith.negf %56 : vector<8x128xf32>
    %58 = math.exp %57 : vector<8x128xf32>
    %cst_28 = arith.constant 1.000000e+00 : f32
    %59 = vector.broadcast %cst_28 : f32 to vector<8x128xf32>
    %60 = arith.addf %59, %58 : vector<8x128xf32>
    %61 = arith.divf %59, %60 : vector<8x128xf32>
    %62 = vector.extract_strided_slice %61 {offsets = [0, 0], sizes = [8, 32], strides = [1, 1]} : vector<8x128xf32> to vector<8x32xf32>
    %63 = vector.extract_strided_slice %61 {offsets = [0, 32], sizes = [8, 32], strides = [1, 1]} : vector<8x128xf32> to vector<8x32xf32>
    %64 = vector.extract_strided_slice %61 {offsets = [0, 64], sizes = [8, 32], strides = [1, 1]} : vector<8x128xf32> to vector<8x32xf32>
    %cst_29 = arith.constant 2.000000e+00 : f32
    %65 = vector.broadcast %cst_29 : f32 to vector<8x32xf32>
    %66 = arith.mulf %65, %64 : vector<8x32xf32>
    %cst_30 = arith.constant 1.000000e+00 : f32
    %67 = vector.broadcast %cst_30 : f32 to vector<8x32xf32>
    %68 = arith.subf %66, %67 : vector<8x32xf32>
    %69 = vector.extract_strided_slice %61 {offsets = [0, 96], sizes = [8, 32], strides = [1, 1]} : vector<8x128xf32> to vector<8x32xf32>
    %70 = arith.mulf %63, %50 : vector<8x32xf32>
    %71 = arith.mulf %62, %68 : vector<8x32xf32>
    %72 = arith.addf %70, %71 : vector<8x32xf32>
    %73 = math.tanh %72 : vector<8x32xf32>
    %74 = arith.mulf %69, %73 : vector<8x32xf32>
    %c16_31 = arith.constant 16 : index
    %c0_32 = arith.constant 0 : index
    %75 = vector.load %arg11[%c16_31, %c0_32] : memref<64x32xf32, #tpu.memory_space<vmem>>, vector<8x32xf32>
    tpu.vector_store %arg11[%c16_31, %c0_32], %74 {strides = array<i32>} : memref<64x32xf32, #tpu.memory_space<vmem>>, vector<8x32xf32>,
    %c24 = arith.constant 24 : index
    %c0_33 = arith.constant 0 : index
    %76 = vector.load %arg10[%c24, %c0_33] : memref<64x128xf32, #tpu.memory_space<vmem>>, vector<8x128xf32>
    %cst_34 = arith.constant dense<0.000000e+00> : vector<8x128xf32>
    %77 = tpu.matmul %74, %7, %cst_34 {dimension_numbers = #tpu.dot_dimension_numbers<[1], [0], [0], [1], [0, 0, 1, 1], [], []>} : vector<8x32xf32>, vector<32x128xf32>, vector<8x128xf32> -> vector<8x128xf32>
    %78 = arith.addf %76, %77 : vector<8x128xf32>
    %79 = arith.negf %78 : vector<8x128xf32>
    %80 = math.exp %79 : vector<8x128xf32>
    %cst_35 = arith.constant 1.000000e+00 : f32
    %81 = vector.broadcast %cst_35 : f32 to vector<8x128xf32>
    %82 = arith.addf %81, %80 : vector<8x128xf32>
    %83 = arith.divf %81, %82 : vector<8x128xf32>
    %84 = vector.extract_strided_slice %83 {offsets = [0, 0], sizes = [8, 32], strides = [1, 1]} : vector<8x128xf32> to vector<8x32xf32>
    %85 = vector.extract_strided_slice %83 {offsets = [0, 32], sizes = [8, 32], strides = [1, 1]} : vector<8x128xf32> to vector<8x32xf32>
    %86 = vector.extract_strided_slice %83 {offsets = [0, 64], sizes = [8, 32], strides = [1, 1]} : vector<8x128xf32> to vector<8x32xf32>
    %cst_36 = arith.constant 2.000000e+00 : f32
    %87 = vector.broadcast %cst_36 : f32 to vector<8x32xf32>
    %88 = arith.mulf %87, %86 : vector<8x32xf32>
    %cst_37 = arith.constant 1.000000e+00 : f32
    %89 = vector.broadcast %cst_37 : f32 to vector<8x32xf32>
    %90 = arith.subf %88, %89 : vector<8x32xf32>
    %91 = vector.extract_strided_slice %83 {offsets = [0, 96], sizes = [8, 32], strides = [1, 1]} : vector<8x128xf32> to vector<8x32xf32>
    %92 = arith.mulf %85, %72 : vector<8x32xf32>
    %93 = arith.mulf %84, %90 : vector<8x32xf32>
    %94 = arith.addf %92, %93 : vector<8x32xf32>
    %95 = math.tanh %94 : vector<8x32xf32>
    %96 = arith.mulf %91, %95 : vector<8x32xf32>
    %c24_38 = arith.constant 24 : index
    %c0_39 = arith.constant 0 : index
    %97 = vector.load %arg11[%c24_38, %c0_39] : memref<64x32xf32, #tpu.memory_space<vmem>>, vector<8x32xf32>
    tpu.vector_store %arg11[%c24_38, %c0_39], %96 {strides = array<i32>} : memref<64x32xf32, #tpu.memory_space<vmem>>, vector<8x32xf32>,
    %c32 = arith.constant 32 : index
    %c0_40 = arith.constant 0 : index
    %98 = vector.load %arg10[%c32, %c0_40] : memref<64x128xf32, #tpu.memory_space<vmem>>, vector<8x128xf32>
    %cst_41 = arith.constant dense<0.000000e+00> : vector<8x128xf32>
    %99 = tpu.matmul %96, %7, %cst_41 {dimension_numbers = #tpu.dot_dimension_numbers<[1], [0], [0], [1], [0, 0, 1, 1], [], []>} : vector<8x32xf32>, vector<32x128xf32>, vector<8x128xf32> -> vector<8x128xf32>
    %100 = arith.addf %98, %99 : vector<8x128xf32>
    %101 = arith.negf %100 : vector<8x128xf32>
    %102 = math.exp %101 : vector<8x128xf32>
    %cst_42 = arith.constant 1.000000e+00 : f32
    %103 = vector.broadcast %cst_42 : f32 to vector<8x128xf32>
    %104 = arith.addf %103, %102 : vector<8x128xf32>
    %105 = arith.divf %103, %104 : vector<8x128xf32>
    %106 = vector.extract_strided_slice %105 {offsets = [0, 0], sizes = [8, 32], strides = [1, 1]} : vector<8x128xf32> to vector<8x32xf32>
    %107 = vector.extract_strided_slice %105 {offsets = [0, 32], sizes = [8, 32], strides = [1, 1]} : vector<8x128xf32> to vector<8x32xf32>
    %108 = vector.extract_strided_slice %105 {offsets = [0, 64], sizes = [8, 32], strides = [1, 1]} : vector<8x128xf32> to vector<8x32xf32>
    %cst_43 = arith.constant 2.000000e+00 : f32
    %109 = vector.broadcast %cst_43 : f32 to vector<8x32xf32>
    %110 = arith.mulf %109, %108 : vector<8x32xf32>
    %cst_44 = arith.constant 1.000000e+00 : f32
    %111 = vector.broadcast %cst_44 : f32 to vector<8x32xf32>
    %112 = arith.subf %110, %111 : vector<8x32xf32>
    %113 = vector.extract_strided_slice %105 {offsets = [0, 96], sizes = [8, 32], strides = [1, 1]} : vector<8x128xf32> to vector<8x32xf32>
    %114 = arith.mulf %107, %94 : vector<8x32xf32>
    %115 = arith.mulf %106, %112 : vector<8x32xf32>
    %116 = arith.addf %114, %115 : vector<8x32xf32>
    %117 = math.tanh %116 : vector<8x32xf32>
    %118 = arith.mulf %113, %117 : vector<8x32xf32>
    %c32_45 = arith.constant 32 : index
    %c0_46 = arith.constant 0 : index
    %119 = vector.load %arg11[%c32_45, %c0_46] : memref<64x32xf32, #tpu.memory_space<vmem>>, vector<8x32xf32>
    tpu.vector_store %arg11[%c32_45, %c0_46], %118 {strides = array<i32>} : memref<64x32xf32, #tpu.memory_space<vmem>>, vector<8x32xf32>,
    %c40 = arith.constant 40 : index
    %c0_47 = arith.constant 0 : index
    %120 = vector.load %arg10[%c40, %c0_47] : memref<64x128xf32, #tpu.memory_space<vmem>>, vector<8x128xf32>
    %cst_48 = arith.constant dense<0.000000e+00> : vector<8x128xf32>
    %121 = tpu.matmul %118, %7, %cst_48 {dimension_numbers = #tpu.dot_dimension_numbers<[1], [0], [0], [1], [0, 0, 1, 1], [], []>} : vector<8x32xf32>, vector<32x128xf32>, vector<8x128xf32> -> vector<8x128xf32>
    %122 = arith.addf %120, %121 : vector<8x128xf32>
    %123 = arith.negf %122 : vector<8x128xf32>
    %124 = math.exp %123 : vector<8x128xf32>
    %cst_49 = arith.constant 1.000000e+00 : f32
    %125 = vector.broadcast %cst_49 : f32 to vector<8x128xf32>
    %126 = arith.addf %125, %124 : vector<8x128xf32>
    %127 = arith.divf %125, %126 : vector<8x128xf32>
    %128 = vector.extract_strided_slice %127 {offsets = [0, 0], sizes = [8, 32], strides = [1, 1]} : vector<8x128xf32> to vector<8x32xf32>
    %129 = vector.extract_strided_slice %127 {offsets = [0, 32], sizes = [8, 32], strides = [1, 1]} : vector<8x128xf32> to vector<8x32xf32>
    %130 = vector.extract_strided_slice %127 {offsets = [0, 64], sizes = [8, 32], strides = [1, 1]} : vector<8x128xf32> to vector<8x32xf32>
    %cst_50 = arith.constant 2.000000e+00 : f32
    %131 = vector.broadcast %cst_50 : f32 to vector<8x32xf32>
    %132 = arith.mulf %131, %130 : vector<8x32xf32>
    %cst_51 = arith.constant 1.000000e+00 : f32
    %133 = vector.broadcast %cst_51 : f32 to vector<8x32xf32>
    %134 = arith.subf %132, %133 : vector<8x32xf32>
    %135 = vector.extract_strided_slice %127 {offsets = [0, 96], sizes = [8, 32], strides = [1, 1]} : vector<8x128xf32> to vector<8x32xf32>
    %136 = arith.mulf %129, %116 : vector<8x32xf32>
    %137 = arith.mulf %128, %134 : vector<8x32xf32>
    %138 = arith.addf %136, %137 : vector<8x32xf32>
    %139 = math.tanh %138 : vector<8x32xf32>
    %140 = arith.mulf %135, %139 : vector<8x32xf32>
    %c40_52 = arith.constant 40 : index
    %c0_53 = arith.constant 0 : index
    %141 = vector.load %arg11[%c40_52, %c0_53] : memref<64x32xf32, #tpu.memory_space<vmem>>, vector<8x32xf32>
    tpu.vector_store %arg11[%c40_52, %c0_53], %140 {strides = array<i32>} : memref<64x32xf32, #tpu.memory_space<vmem>>, vector<8x32xf32>,
    %c48 = arith.constant 48 : index
    %c0_54 = arith.constant 0 : index
    %142 = vector.load %arg10[%c48, %c0_54] : memref<64x128xf32, #tpu.memory_space<vmem>>, vector<8x128xf32>
    %cst_55 = arith.constant dense<0.000000e+00> : vector<8x128xf32>
    %143 = tpu.matmul %140, %7, %cst_55 {dimension_numbers = #tpu.dot_dimension_numbers<[1], [0], [0], [1], [0, 0, 1, 1], [], []>} : vector<8x32xf32>, vector<32x128xf32>, vector<8x128xf32> -> vector<8x128xf32>
    %144 = arith.addf %142, %143 : vector<8x128xf32>
    %145 = arith.negf %144 : vector<8x128xf32>
    %146 = math.exp %145 : vector<8x128xf32>
    %cst_56 = arith.constant 1.000000e+00 : f32
    %147 = vector.broadcast %cst_56 : f32 to vector<8x128xf32>
    %148 = arith.addf %147, %146 : vector<8x128xf32>
    %149 = arith.divf %147, %148 : vector<8x128xf32>
    %150 = vector.extract_strided_slice %149 {offsets = [0, 0], sizes = [8, 32], strides = [1, 1]} : vector<8x128xf32> to vector<8x32xf32>
    %151 = vector.extract_strided_slice %149 {offsets = [0, 32], sizes = [8, 32], strides = [1, 1]} : vector<8x128xf32> to vector<8x32xf32>
    %152 = vector.extract_strided_slice %149 {offsets = [0, 64], sizes = [8, 32], strides = [1, 1]} : vector<8x128xf32> to vector<8x32xf32>
    %cst_57 = arith.constant 2.000000e+00 : f32
    %153 = vector.broadcast %cst_57 : f32 to vector<8x32xf32>
    %154 = arith.mulf %153, %152 : vector<8x32xf32>
    %cst_58 = arith.constant 1.000000e+00 : f32
    %155 = vector.broadcast %cst_58 : f32 to vector<8x32xf32>
    %156 = arith.subf %154, %155 : vector<8x32xf32>
    %157 = vector.extract_strided_slice %149 {offsets = [0, 96], sizes = [8, 32], strides = [1, 1]} : vector<8x128xf32> to vector<8x32xf32>
    %158 = arith.mulf %151, %138 : vector<8x32xf32>
    %159 = arith.mulf %150, %156 : vector<8x32xf32>
    %160 = arith.addf %158, %159 : vector<8x32xf32>
    %161 = math.tanh %160 : vector<8x32xf32>
    %162 = arith.mulf %157, %161 : vector<8x32xf32>
    %c48_59 = arith.constant 48 : index
    %c0_60 = arith.constant 0 : index
    %163 = vector.load %arg11[%c48_59, %c0_60] : memref<64x32xf32, #tpu.memory_space<vmem>>, vector<8x32xf32>
    tpu.vector_store %arg11[%c48_59, %c0_60], %162 {strides = array<i32>} : memref<64x32xf32, #tpu.memory_space<vmem>>, vector<8x32xf32>,
    %c56 = arith.constant 56 : index
    %c0_61 = arith.constant 0 : index
    %164 = vector.load %arg10[%c56, %c0_61] : memref<64x128xf32, #tpu.memory_space<vmem>>, vector<8x128xf32>
    %cst_62 = arith.constant dense<0.000000e+00> : vector<8x128xf32>
    %165 = tpu.matmul %162, %7, %cst_62 {dimension_numbers = #tpu.dot_dimension_numbers<[1], [0], [0], [1], [0, 0, 1, 1], [], []>} : vector<8x32xf32>, vector<32x128xf32>, vector<8x128xf32> -> vector<8x128xf32>
    %166 = arith.addf %164, %165 : vector<8x128xf32>
    %167 = arith.negf %166 : vector<8x128xf32>
    %168 = math.exp %167 : vector<8x128xf32>
    %cst_63 = arith.constant 1.000000e+00 : f32
    %169 = vector.broadcast %cst_63 : f32 to vector<8x128xf32>
    %170 = arith.addf %169, %168 : vector<8x128xf32>
    %171 = arith.divf %169, %170 : vector<8x128xf32>
    %172 = vector.extract_strided_slice %171 {offsets = [0, 0], sizes = [8, 32], strides = [1, 1]} : vector<8x128xf32> to vector<8x32xf32>
    %173 = vector.extract_strided_slice %171 {offsets = [0, 32], sizes = [8, 32], strides = [1, 1]} : vector<8x128xf32> to vector<8x32xf32>
    %174 = vector.extract_strided_slice %171 {offsets = [0, 64], sizes = [8, 32], strides = [1, 1]} : vector<8x128xf32> to vector<8x32xf32>
    %cst_64 = arith.constant 2.000000e+00 : f32
    %175 = vector.broadcast %cst_64 : f32 to vector<8x32xf32>
    %176 = arith.mulf %175, %174 : vector<8x32xf32>
    %cst_65 = arith.constant 1.000000e+00 : f32
    %177 = vector.broadcast %cst_65 : f32 to vector<8x32xf32>
    %178 = arith.subf %176, %177 : vector<8x32xf32>
    %179 = vector.extract_strided_slice %171 {offsets = [0, 96], sizes = [8, 32], strides = [1, 1]} : vector<8x128xf32> to vector<8x32xf32>
    %180 = arith.mulf %173, %160 : vector<8x32xf32>
    %181 = arith.mulf %172, %178 : vector<8x32xf32>
    %182 = arith.addf %180, %181 : vector<8x32xf32>
    %183 = math.tanh %182 : vector<8x32xf32>
    %184 = arith.mulf %179, %183 : vector<8x32xf32>
    %c56_66 = arith.constant 56 : index
    %c0_67 = arith.constant 0 : index
    %185 = vector.load %arg11[%c56_66, %c0_67] : memref<64x32xf32, #tpu.memory_space<vmem>>, vector<8x32xf32>
    tpu.vector_store %arg11[%c56_66, %c0_67], %184 {strides = array<i32>} : memref<64x32xf32, #tpu.memory_space<vmem>>, vector<8x32xf32>,
    %c0_68 = arith.constant 0 : index
    %c0_69 = arith.constant 0 : index
    %186 = vector.load %arg11[%c0_68, %c0_69] : memref<64x32xf32, #tpu.memory_space<vmem>>, vector<64x32xf32>
    %c0_70 = arith.constant 0 : index
    %c0_71 = arith.constant 0 : index
    %187 = vector.load %arg4[%c0_70, %c0_71] : memref<32x128xf32, #tpu.memory_space<vmem>>, vector<32x128xf32>
    %cst_72 = arith.constant dense<0.000000e+00> : vector<64x128xf32>
    %188 = tpu.matmul %186, %187, %cst_72 {dimension_numbers = #tpu.dot_dimension_numbers<[1], [0], [0], [1], [0, 0, 1, 1], [], []>} : vector<64x32xf32>, vector<32x128xf32>, vector<64x128xf32> -> vector<64x128xf32>
    %c0_73 = arith.constant 0 : index
    %c0_74 = arith.constant 0 : index
    %189 = vector.load %arg6[%c0_73, %c0_74] : memref<1x128xf32, #tpu.memory_space<vmem>>, vector<1x128xf32>
    %190 = vector.broadcast %189 : vector<1x128xf32> to vector<64x128xf32>
    %191 = arith.addf %188, %190 : vector<64x128xf32>
    %c0_75 = arith.constant 0 : index
    %c0_76 = arith.constant 0 : index
    %192 = vector.load %arg10[%c0_75, %c0_76] : memref<64x128xf32, #tpu.memory_space<vmem>>, vector<64x128xf32>
    tpu.vector_store %arg10[%c0_75, %c0_76], %191 {strides = array<i32>} : memref<64x128xf32, #tpu.memory_space<vmem>>, vector<64x128xf32>,
    %c0_77 = arith.constant 0 : index
    %c0_78 = arith.constant 0 : index
    %193 = vector.load %arg5[%c0_77, %c0_78] : memref<32x128xf32, #tpu.memory_space<vmem>>, vector<32x128xf32>
    %cst_79 = arith.constant 0.000000e+00 : f32
    %194 = vector.broadcast %cst_79 : f32 to vector<8x32xf32>
    %cst_80 = arith.constant 0.000000e+00 : f32
    %195 = vector.broadcast %cst_80 : f32 to vector<8x32xf32>
    %c0_81 = arith.constant 0 : index
    %c0_82 = arith.constant 0 : index
    %196 = vector.load %arg10[%c0_81, %c0_82] : memref<64x128xf32, #tpu.memory_space<vmem>>, vector<8x128xf32>
    %cst_83 = arith.constant dense<0.000000e+00> : vector<8x128xf32>
    %197 = tpu.matmul %194, %193, %cst_83 {dimension_numbers = #tpu.dot_dimension_numbers<[1], [0], [0], [1], [0, 0, 1, 1], [], []>} : vector<8x32xf32>, vector<32x128xf32>, vector<8x128xf32> -> vector<8x128xf32>
    %198 = arith.addf %196, %197 : vector<8x128xf32>
    %199 = arith.negf %198 : vector<8x128xf32>
    %200 = math.exp %199 : vector<8x128xf32>
    %cst_84 = arith.constant 1.000000e+00 : f32
    %201 = vector.broadcast %cst_84 : f32 to vector<8x128xf32>
    %202 = arith.addf %201, %200 : vector<8x128xf32>
    %203 = arith.divf %201, %202 : vector<8x128xf32>
    %204 = vector.extract_strided_slice %203 {offsets = [0, 0], sizes = [8, 32], strides = [1, 1]} : vector<8x128xf32> to vector<8x32xf32>
    %205 = vector.extract_strided_slice %203 {offsets = [0, 32], sizes = [8, 32], strides = [1, 1]} : vector<8x128xf32> to vector<8x32xf32>
    %206 = vector.extract_strided_slice %203 {offsets = [0, 64], sizes = [8, 32], strides = [1, 1]} : vector<8x128xf32> to vector<8x32xf32>
    %cst_85 = arith.constant 2.000000e+00 : f32
    %207 = vector.broadcast %cst_85 : f32 to vector<8x32xf32>
    %208 = arith.mulf %207, %206 : vector<8x32xf32>
    %cst_86 = arith.constant 1.000000e+00 : f32
    %209 = vector.broadcast %cst_86 : f32 to vector<8x32xf32>
    %210 = arith.subf %208, %209 : vector<8x32xf32>
    %211 = vector.extract_strided_slice %203 {offsets = [0, 96], sizes = [8, 32], strides = [1, 1]} : vector<8x128xf32> to vector<8x32xf32>
    %212 = arith.mulf %205, %195 : vector<8x32xf32>
    %213 = arith.mulf %204, %210 : vector<8x32xf32>
    %214 = arith.addf %212, %213 : vector<8x32xf32>
    %215 = math.tanh %214 : vector<8x32xf32>
    %216 = arith.mulf %211, %215 : vector<8x32xf32>
    %c8_87 = arith.constant 8 : index
    %c0_88 = arith.constant 0 : index
    %217 = vector.load %arg10[%c8_87, %c0_88] : memref<64x128xf32, #tpu.memory_space<vmem>>, vector<8x128xf32>
    %cst_89 = arith.constant dense<0.000000e+00> : vector<8x128xf32>
    %218 = tpu.matmul %216, %193, %cst_89 {dimension_numbers = #tpu.dot_dimension_numbers<[1], [0], [0], [1], [0, 0, 1, 1], [], []>} : vector<8x32xf32>, vector<32x128xf32>, vector<8x128xf32> -> vector<8x128xf32>
    %219 = arith.addf %217, %218 : vector<8x128xf32>
    %220 = arith.negf %219 : vector<8x128xf32>
    %221 = math.exp %220 : vector<8x128xf32>
    %cst_90 = arith.constant 1.000000e+00 : f32
    %222 = vector.broadcast %cst_90 : f32 to vector<8x128xf32>
    %223 = arith.addf %222, %221 : vector<8x128xf32>
    %224 = arith.divf %222, %223 : vector<8x128xf32>
    %225 = vector.extract_strided_slice %224 {offsets = [0, 0], sizes = [8, 32], strides = [1, 1]} : vector<8x128xf32> to vector<8x32xf32>
    %226 = vector.extract_strided_slice %224 {offsets = [0, 32], sizes = [8, 32], strides = [1, 1]} : vector<8x128xf32> to vector<8x32xf32>
    %227 = vector.extract_strided_slice %224 {offsets = [0, 64], sizes = [8, 32], strides = [1, 1]} : vector<8x128xf32> to vector<8x32xf32>
    %cst_91 = arith.constant 2.000000e+00 : f32
    %228 = vector.broadcast %cst_91 : f32 to vector<8x32xf32>
    %229 = arith.mulf %228, %227 : vector<8x32xf32>
    %cst_92 = arith.constant 1.000000e+00 : f32
    %230 = vector.broadcast %cst_92 : f32 to vector<8x32xf32>
    %231 = arith.subf %229, %230 : vector<8x32xf32>
    %232 = vector.extract_strided_slice %224 {offsets = [0, 96], sizes = [8, 32], strides = [1, 1]} : vector<8x128xf32> to vector<8x32xf32>
    %233 = arith.mulf %226, %214 : vector<8x32xf32>
    %234 = arith.mulf %225, %231 : vector<8x32xf32>
    %235 = arith.addf %233, %234 : vector<8x32xf32>
    %236 = math.tanh %235 : vector<8x32xf32>
    %237 = arith.mulf %232, %236 : vector<8x32xf32>
    %c16_93 = arith.constant 16 : index
    %c0_94 = arith.constant 0 : index
    %238 = vector.load %arg10[%c16_93, %c0_94] : memref<64x128xf32, #tpu.memory_space<vmem>>, vector<8x128xf32>
    %cst_95 = arith.constant dense<0.000000e+00> : vector<8x128xf32>
    %239 = tpu.matmul %237, %193, %cst_95 {dimension_numbers = #tpu.dot_dimension_numbers<[1], [0], [0], [1], [0, 0, 1, 1], [], []>} : vector<8x32xf32>, vector<32x128xf32>, vector<8x128xf32> -> vector<8x128xf32>
    %240 = arith.addf %238, %239 : vector<8x128xf32>
    %241 = arith.negf %240 : vector<8x128xf32>
    %242 = math.exp %241 : vector<8x128xf32>
    %cst_96 = arith.constant 1.000000e+00 : f32
    %243 = vector.broadcast %cst_96 : f32 to vector<8x128xf32>
    %244 = arith.addf %243, %242 : vector<8x128xf32>
    %245 = arith.divf %243, %244 : vector<8x128xf32>
    %246 = vector.extract_strided_slice %245 {offsets = [0, 0], sizes = [8, 32], strides = [1, 1]} : vector<8x128xf32> to vector<8x32xf32>
    %247 = vector.extract_strided_slice %245 {offsets = [0, 32], sizes = [8, 32], strides = [1, 1]} : vector<8x128xf32> to vector<8x32xf32>
    %248 = vector.extract_strided_slice %245 {offsets = [0, 64], sizes = [8, 32], strides = [1, 1]} : vector<8x128xf32> to vector<8x32xf32>
    %cst_97 = arith.constant 2.000000e+00 : f32
    %249 = vector.broadcast %cst_97 : f32 to vector<8x32xf32>
    %250 = arith.mulf %249, %248 : vector<8x32xf32>
    %cst_98 = arith.constant 1.000000e+00 : f32
    %251 = vector.broadcast %cst_98 : f32 to vector<8x32xf32>
    %252 = arith.subf %250, %251 : vector<8x32xf32>
    %253 = vector.extract_strided_slice %245 {offsets = [0, 96], sizes = [8, 32], strides = [1, 1]} : vector<8x128xf32> to vector<8x32xf32>
    %254 = arith.mulf %247, %235 : vector<8x32xf32>
    %255 = arith.mulf %246, %252 : vector<8x32xf32>
    %256 = arith.addf %254, %255 : vector<8x32xf32>
    %257 = math.tanh %256 : vector<8x32xf32>
    %258 = arith.mulf %253, %257 : vector<8x32xf32>
    %c24_99 = arith.constant 24 : index
    %c0_100 = arith.constant 0 : index
    %259 = vector.load %arg10[%c24_99, %c0_100] : memref<64x128xf32, #tpu.memory_space<vmem>>, vector<8x128xf32>
    %cst_101 = arith.constant dense<0.000000e+00> : vector<8x128xf32>
    %260 = tpu.matmul %258, %193, %cst_101 {dimension_numbers = #tpu.dot_dimension_numbers<[1], [0], [0], [1], [0, 0, 1, 1], [], []>} : vector<8x32xf32>, vector<32x128xf32>, vector<8x128xf32> -> vector<8x128xf32>
    %261 = arith.addf %259, %260 : vector<8x128xf32>
    %262 = arith.negf %261 : vector<8x128xf32>
    %263 = math.exp %262 : vector<8x128xf32>
    %cst_102 = arith.constant 1.000000e+00 : f32
    %264 = vector.broadcast %cst_102 : f32 to vector<8x128xf32>
    %265 = arith.addf %264, %263 : vector<8x128xf32>
    %266 = arith.divf %264, %265 : vector<8x128xf32>
    %267 = vector.extract_strided_slice %266 {offsets = [0, 0], sizes = [8, 32], strides = [1, 1]} : vector<8x128xf32> to vector<8x32xf32>
    %268 = vector.extract_strided_slice %266 {offsets = [0, 32], sizes = [8, 32], strides = [1, 1]} : vector<8x128xf32> to vector<8x32xf32>
    %269 = vector.extract_strided_slice %266 {offsets = [0, 64], sizes = [8, 32], strides = [1, 1]} : vector<8x128xf32> to vector<8x32xf32>
    %cst_103 = arith.constant 2.000000e+00 : f32
    %270 = vector.broadcast %cst_103 : f32 to vector<8x32xf32>
    %271 = arith.mulf %270, %269 : vector<8x32xf32>
    %cst_104 = arith.constant 1.000000e+00 : f32
    %272 = vector.broadcast %cst_104 : f32 to vector<8x32xf32>
    %273 = arith.subf %271, %272 : vector<8x32xf32>
    %274 = vector.extract_strided_slice %266 {offsets = [0, 96], sizes = [8, 32], strides = [1, 1]} : vector<8x128xf32> to vector<8x32xf32>
    %275 = arith.mulf %268, %256 : vector<8x32xf32>
    %276 = arith.mulf %267, %273 : vector<8x32xf32>
    %277 = arith.addf %275, %276 : vector<8x32xf32>
    %278 = math.tanh %277 : vector<8x32xf32>
    %279 = arith.mulf %274, %278 : vector<8x32xf32>
    %c32_105 = arith.constant 32 : index
    %c0_106 = arith.constant 0 : index
    %280 = vector.load %arg10[%c32_105, %c0_106] : memref<64x128xf32, #tpu.memory_space<vmem>>, vector<8x128xf32>
    %cst_107 = arith.constant dense<0.000000e+00> : vector<8x128xf32>
    %281 = tpu.matmul %279, %193, %cst_107 {dimension_numbers = #tpu.dot_dimension_numbers<[1], [0], [0], [1], [0, 0, 1, 1], [], []>} : vector<8x32xf32>, vector<32x128xf32>, vector<8x128xf32> -> vector<8x128xf32>
    %282 = arith.addf %280, %281 : vector<8x128xf32>
    %283 = arith.negf %282 : vector<8x128xf32>
    %284 = math.exp %283 : vector<8x128xf32>
    %cst_108 = arith.constant 1.000000e+00 : f32
    %285 = vector.broadcast %cst_108 : f32 to vector<8x128xf32>
    %286 = arith.addf %285, %284 : vector<8x128xf32>
    %287 = arith.divf %285, %286 : vector<8x128xf32>
    %288 = vector.extract_strided_slice %287 {offsets = [0, 0], sizes = [8, 32], strides = [1, 1]} : vector<8x128xf32> to vector<8x32xf32>
    %289 = vector.extract_strided_slice %287 {offsets = [0, 32], sizes = [8, 32], strides = [1, 1]} : vector<8x128xf32> to vector<8x32xf32>
    %290 = vector.extract_strided_slice %287 {offsets = [0, 64], sizes = [8, 32], strides = [1, 1]} : vector<8x128xf32> to vector<8x32xf32>
    %cst_109 = arith.constant 2.000000e+00 : f32
    %291 = vector.broadcast %cst_109 : f32 to vector<8x32xf32>
    %292 = arith.mulf %291, %290 : vector<8x32xf32>
    %cst_110 = arith.constant 1.000000e+00 : f32
    %293 = vector.broadcast %cst_110 : f32 to vector<8x32xf32>
    %294 = arith.subf %292, %293 : vector<8x32xf32>
    %295 = vector.extract_strided_slice %287 {offsets = [0, 96], sizes = [8, 32], strides = [1, 1]} : vector<8x128xf32> to vector<8x32xf32>
    %296 = arith.mulf %289, %277 : vector<8x32xf32>
    %297 = arith.mulf %288, %294 : vector<8x32xf32>
    %298 = arith.addf %296, %297 : vector<8x32xf32>
    %299 = math.tanh %298 : vector<8x32xf32>
    %300 = arith.mulf %295, %299 : vector<8x32xf32>
    %c40_111 = arith.constant 40 : index
    %c0_112 = arith.constant 0 : index
    %301 = vector.load %arg10[%c40_111, %c0_112] : memref<64x128xf32, #tpu.memory_space<vmem>>, vector<8x128xf32>
    %cst_113 = arith.constant dense<0.000000e+00> : vector<8x128xf32>
    %302 = tpu.matmul %300, %193, %cst_113 {dimension_numbers = #tpu.dot_dimension_numbers<[1], [0], [0], [1], [0, 0, 1, 1], [], []>} : vector<8x32xf32>, vector<32x128xf32>, vector<8x128xf32> -> vector<8x128xf32>
    %303 = arith.addf %301, %302 : vector<8x128xf32>
    %304 = arith.negf %303 : vector<8x128xf32>
    %305 = math.exp %304 : vector<8x128xf32>
    %cst_114 = arith.constant 1.000000e+00 : f32
    %306 = vector.broadcast %cst_114 : f32 to vector<8x128xf32>
    %307 = arith.addf %306, %305 : vector<8x128xf32>
    %308 = arith.divf %306, %307 : vector<8x128xf32>
    %309 = vector.extract_strided_slice %308 {offsets = [0, 0], sizes = [8, 32], strides = [1, 1]} : vector<8x128xf32> to vector<8x32xf32>
    %310 = vector.extract_strided_slice %308 {offsets = [0, 32], sizes = [8, 32], strides = [1, 1]} : vector<8x128xf32> to vector<8x32xf32>
    %311 = vector.extract_strided_slice %308 {offsets = [0, 64], sizes = [8, 32], strides = [1, 1]} : vector<8x128xf32> to vector<8x32xf32>
    %cst_115 = arith.constant 2.000000e+00 : f32
    %312 = vector.broadcast %cst_115 : f32 to vector<8x32xf32>
    %313 = arith.mulf %312, %311 : vector<8x32xf32>
    %cst_116 = arith.constant 1.000000e+00 : f32
    %314 = vector.broadcast %cst_116 : f32 to vector<8x32xf32>
    %315 = arith.subf %313, %314 : vector<8x32xf32>
    %316 = vector.extract_strided_slice %308 {offsets = [0, 96], sizes = [8, 32], strides = [1, 1]} : vector<8x128xf32> to vector<8x32xf32>
    %317 = arith.mulf %310, %298 : vector<8x32xf32>
    %318 = arith.mulf %309, %315 : vector<8x32xf32>
    %319 = arith.addf %317, %318 : vector<8x32xf32>
    %320 = math.tanh %319 : vector<8x32xf32>
    %321 = arith.mulf %316, %320 : vector<8x32xf32>
    %c48_117 = arith.constant 48 : index
    %c0_118 = arith.constant 0 : index
    %322 = vector.load %arg10[%c48_117, %c0_118] : memref<64x128xf32, #tpu.memory_space<vmem>>, vector<8x128xf32>
    %cst_119 = arith.constant dense<0.000000e+00> : vector<8x128xf32>
    %323 = tpu.matmul %321, %193, %cst_119 {dimension_numbers = #tpu.dot_dimension_numbers<[1], [0], [0], [1], [0, 0, 1, 1], [], []>} : vector<8x32xf32>, vector<32x128xf32>, vector<8x128xf32> -> vector<8x128xf32>
    %324 = arith.addf %322, %323 : vector<8x128xf32>
    %325 = arith.negf %324 : vector<8x128xf32>
    %326 = math.exp %325 : vector<8x128xf32>
    %cst_120 = arith.constant 1.000000e+00 : f32
    %327 = vector.broadcast %cst_120 : f32 to vector<8x128xf32>
    %328 = arith.addf %327, %326 : vector<8x128xf32>
    %329 = arith.divf %327, %328 : vector<8x128xf32>
    %330 = vector.extract_strided_slice %329 {offsets = [0, 0], sizes = [8, 32], strides = [1, 1]} : vector<8x128xf32> to vector<8x32xf32>
    %331 = vector.extract_strided_slice %329 {offsets = [0, 32], sizes = [8, 32], strides = [1, 1]} : vector<8x128xf32> to vector<8x32xf32>
    %332 = vector.extract_strided_slice %329 {offsets = [0, 64], sizes = [8, 32], strides = [1, 1]} : vector<8x128xf32> to vector<8x32xf32>
    %cst_121 = arith.constant 2.000000e+00 : f32
    %333 = vector.broadcast %cst_121 : f32 to vector<8x32xf32>
    %334 = arith.mulf %333, %332 : vector<8x32xf32>
    %cst_122 = arith.constant 1.000000e+00 : f32
    %335 = vector.broadcast %cst_122 : f32 to vector<8x32xf32>
    %336 = arith.subf %334, %335 : vector<8x32xf32>
    %337 = vector.extract_strided_slice %329 {offsets = [0, 96], sizes = [8, 32], strides = [1, 1]} : vector<8x128xf32> to vector<8x32xf32>
    %338 = arith.mulf %331, %319 : vector<8x32xf32>
    %339 = arith.mulf %330, %336 : vector<8x32xf32>
    %340 = arith.addf %338, %339 : vector<8x32xf32>
    %341 = math.tanh %340 : vector<8x32xf32>
    %342 = arith.mulf %337, %341 : vector<8x32xf32>
    %c56_123 = arith.constant 56 : index
    %c0_124 = arith.constant 0 : index
    %343 = vector.load %arg10[%c56_123, %c0_124] : memref<64x128xf32, #tpu.memory_space<vmem>>, vector<8x128xf32>
    %cst_125 = arith.constant dense<0.000000e+00> : vector<8x128xf32>
    %344 = tpu.matmul %342, %193, %cst_125 {dimension_numbers = #tpu.dot_dimension_numbers<[1], [0], [0], [1], [0, 0, 1, 1], [], []>} : vector<8x32xf32>, vector<32x128xf32>, vector<8x128xf32> -> vector<8x128xf32>
    %345 = arith.addf %343, %344 : vector<8x128xf32>
    %346 = arith.negf %345 : vector<8x128xf32>
    %347 = math.exp %346 : vector<8x128xf32>
    %cst_126 = arith.constant 1.000000e+00 : f32
    %348 = vector.broadcast %cst_126 : f32 to vector<8x128xf32>
    %349 = arith.addf %348, %347 : vector<8x128xf32>
    %350 = arith.divf %348, %349 : vector<8x128xf32>
    %351 = vector.extract_strided_slice %350 {offsets = [0, 0], sizes = [8, 32], strides = [1, 1]} : vector<8x128xf32> to vector<8x32xf32>
    %352 = vector.extract_strided_slice %350 {offsets = [0, 32], sizes = [8, 32], strides = [1, 1]} : vector<8x128xf32> to vector<8x32xf32>
    %353 = vector.extract_strided_slice %350 {offsets = [0, 64], sizes = [8, 32], strides = [1, 1]} : vector<8x128xf32> to vector<8x32xf32>
    %cst_127 = arith.constant 2.000000e+00 : f32
    %354 = vector.broadcast %cst_127 : f32 to vector<8x32xf32>
    %355 = arith.mulf %354, %353 : vector<8x32xf32>
    %cst_128 = arith.constant 1.000000e+00 : f32
    %356 = vector.broadcast %cst_128 : f32 to vector<8x32xf32>
    %357 = arith.subf %355, %356 : vector<8x32xf32>
    %358 = vector.extract_strided_slice %350 {offsets = [0, 96], sizes = [8, 32], strides = [1, 1]} : vector<8x128xf32> to vector<8x32xf32>
    %359 = arith.mulf %352, %340 : vector<8x32xf32>
    %360 = arith.mulf %351, %357 : vector<8x32xf32>
    %361 = arith.addf %359, %360 : vector<8x32xf32>
    %362 = math.tanh %361 : vector<8x32xf32>
    %363 = arith.mulf %358, %362 : vector<8x32xf32>
    %c0_129 = arith.constant 0 : index
    %c0_130 = arith.constant 0 : index
    %364 = vector.load %arg7[%c0_129, %c0_130] : memref<32x1xf32, #tpu.memory_space<vmem>>, vector<32x1xf32>
    %cst_131 = arith.constant dense<0.000000e+00> : vector<8x1xf32>
    %365 = tpu.matmul %363, %364, %cst_131 {dimension_numbers = #tpu.dot_dimension_numbers<[1], [0], [0], [1], [0, 0, 1, 1], [], []>} : vector<8x32xf32>, vector<32x1xf32>, vector<8x1xf32> -> vector<8x1xf32>
    %c0_132 = arith.constant 0 : index
    %c0_133 = arith.constant 0 : index
    %366 = vector.load %arg8[%c0_132, %c0_133] : memref<1x1xf32, #tpu.memory_space<vmem>>, vector<1x1xf32>
    %367 = vector.broadcast %366 : vector<1x1xf32> to vector<8x1xf32>
    %368 = arith.addf %365, %367 : vector<8x1xf32>
    %c0_134 = arith.constant 0 : index
    %c0_135 = arith.constant 0 : index
    %369 = vector.load %arg9[%c0_134, %c0_135] : memref<8x1xf32, #tpu.memory_space<vmem>>, vector<8x1xf32>
    tpu.vector_store %arg9[%c0_134, %c0_135], %368 {strides = array<i32>} : memref<8x1xf32, #tpu.memory_space<vmem>>, vector<8x1xf32>,
    return
  }
}

</mosaic_0001>

<bundles_post_ra>
// kernel: tpu_custom_call.1
= control target key start
LH: loop header
LB: loop body
LE: loop exit
PB: predicated region body
PF: predicated region fallthrough
CT: control target
= control target key end

     0   :  { %s3108_s0 = inlined_call_operand.vmem [shape: f32[64,16], index: 0, kind: input, shape index: {}]   ;;  %s3109_s1 = inlined_call_operand.hbm [shape: f32[16,128], index: 1, kind: input, shape index: {}]   ;;  %s3110_s2 = inlined_call_operand.vmem [shape: f32[32,128], index: 2, kind: input, shape index: {}]   ;;  %s3111_s3 = inlined_call_operand.vmem [shape: f32[1,128], index: 3, kind: input, shape index: {}]   ;;  %s3112_s4 = inlined_call_operand.vmem [shape: f32[32,128], index: 4, kind: input, shape index: {}]   ;;  %s3113_s5 = inlined_call_operand.vmem [shape: f32[32,128], index: 5, kind: input, shape index: {}]   ;;  %s3114_s6 = inlined_call_operand.vmem [shape: f32[1,128], index: 6, kind: input, shape index: {}]   ;;  %s3115_s7 = inlined_call_operand.vmem [shape: f32[32,1], index: 7, kind: input, shape index: {}]   ;;  %s3116_s8 = inlined_call_operand.<no memory space> [shape: f32[1,1], index: 8, kind: input, shape index: {}]   ;;  %s3117_s9 = inlined_call_operand.vmem [shape: f32[8,1], index: 9, kind: output, shape index: {}]  }
   0x1   :  { %v14_v0 = vstv %s3116_s8 }
   0x2   :  { %15 = vst [vmem:[#allocation4] sm:$0x1] %v14_v0 }
   0x3   :  { %16 = vsyncpa [#allocation6], 0  ;;  %s2626_s11 = smov [#allocation5]  }
   0x4   :  { %s24_s12 = sshll.u32 %s2626_s11, 4  ;;  %s25_s12 = int_to_ptr.vmem [resolvable:$true] %s24_s12 }
   0x5   :  { %s2612_s13 = scalar_lea.vmem %s25_s12, 256  ;;  %p2617_p1 = scmp.lt.s32.totalorder %s25_s12, %s25_s12 }
   0x6   :  { %p2613_p0 = scmp.ne.s32.totalorder %s25_s12, %s2612_s13  ;;  %p2618_p2 = scmp.lt.s32.totalorder %s2612_s13, %s2612_s13 }
   0x8   :  { %p2619_p3 = por %p2618_p2, %p2617_p1 }
   0xa   :  { %p2620_p4 = pnand %p2619_p3, %p2613_p0 }
   0xc   :  { %2623 = shalt.err (!%p2620_p4)
}
   0xd   :  { %s2627_s14 = smov 128   ;;  %s2628_s15 = smov 8  }
   0xe   :  { %30 = dma.hbm_to_vmem [thread:$0]  %s3109_s1, 256, %s25_s12, [#allocation6], %s2627_s14, %s2627_s14, %s2628_s15  }
   0xf   :  { %2624 = dma.done.wait [#allocation6], 256  }
  0x10   :  { %2625 = vsyncadd [#allocation6], 4294967040  ;;  %v2629_v1 = vmov 0.0   ;;  %vm2630_vm0 = vmmov 0   ;;  %v57_v2 = vld [vmem:[#allocation5 + $0x8] sm:$0xff]  ;;  %v2695_v3 = vld [vmem:[%s3110_s2 + $0x18] sm:$0xff] }
  0x11   :  { %2294 = vmatprep.subr.mxu1 %v2629_v1  ;;  %2302 = vmatprep.mubr.msk.f32.mxu1 %vm2630_vm0, %v2629_v1  ;;  %v56_v4 = vld [vmem:[#allocation5] sm:$0xff]  ;;  %v2701_v5 = vld [vmem:[%s3110_s2 + $0x10] sm:$0xff]  ;;  %vm65_vm1 = vcmask 130048   ;;  %v2751_v11 = vld [vmem:[%s3111_s3] ss:$0 sm:$0xff]  ;;  %s2631_s29 = smov 64  }
  0x12   :  { %2278 = vmatprep.subr.mxu0 %v57_v2  ;;  %2295 = vmatpush3.msra.mxu1 %v2695_v3  ;;  %v48_v6 = vld [vmem:[%s3108_s0] sm:$0xff]  ;;  %v49_v7 = vld [vmem:[%s3108_s0 + $0x8] sm:$0xff]  ;;  %s2632_s3 = smov 32   ;;  %vm208_vm2 = vcmask 261120   ;;  %v50_v47 = vld [vmem:[%s3108_s0 + $0x10] sm:$0xff]  ;;  %vm2098_vm3 = vcmask 7168  }
  0x13   :  { %2279 = vmatpush3.msra.mxu0 %v57_v2  ;;  %2296 = vmatprep.subr.mxu1 %v2629_v1  ;;  %v2714_v8 = vld [vmem:[%s3110_s2 + $0x8] sm:$0xff]  ;;  %v2722_v9 = vld [vmem:[%s3110_s2] sm:$0xff]  ;;  %v51_v48 = vld [vmem:[%s3108_s0 + $0x18] sm:$0xff] }
  0x14   :  { %2280 = vmatprep.subr.mxu0 %v56_v4  ;;  %2297 = vmatpush3.msra.mxu1 %v2701_v5  ;;  %v52_v49 = vld [vmem:[%s3108_s0 + $0x20] sm:$0xff]  ;;  %v53_v50 = vld [vmem:[%s3108_s0 + $0x28] sm:$0xff]  ;;  %v54_v51 = vld [vmem:[%s3108_s0 + $0x30] sm:$0xff] }
  0x15   :  { %2281 = vmatpush3.msra.mxu0 %v56_v4  ;;  %2282 = vmatprep.mubr.msk.f32.mxu0 %vm65_vm1, %v48_v6  ;;  %v55_v52 = vld [vmem:[%s3108_s0 + $0x38] sm:$0xff] }
  0x16   :  { %2298 = vmatprep.subr.mxu1 %v2629_v1  ;;  %2283 = vmatmul.mubr.msk.f32.vlgmr.msra.gmra.mxu0 %vm65_vm1, %v49_v7 }
  0x17   :  { %2299 = vmatpush3.msra.mxu1 %v2714_v8  ;;  %2316 = vmatprep.subr.mxu0 %v2629_v1 }
  0x18   :  { %2300 = vmatprep.subr.mxu1 %v2629_v1  ;;  %2317 = vmatpush3.msra.mxu0 %v2695_v3 }
  0x19   :  { %2301 = vmatpush3.msra.mxu1 %v2722_v9  ;;  %2318 = vmatprep.subr.mxu0 %v2629_v1 }
  0x1a   :  { %2303 = vmatmul.mubr.f32.vlgmr.msra.gmra.mxu1 %v2629_v1  ;;  %2305 = vmatprep.subr.mxu1 %v2629_v1 }
  0x1b   :  { %2306 = vmatpush3.msra.mxu1 %v2695_v3  ;;  %2313 = vmatprep.mubr.msk.f32.mxu1 %vm2630_vm0, %v2629_v1 }
  0x1c   :  { %2307 = vmatprep.subr.mxu1 %v2629_v1  ;;  %2319 = vmatpush3.msra.mxu0 %v2701_v5 }
  0x1d   :  { %2308 = vmatpush3.msra.mxu1 %v2701_v5  ;;  %2320 = vmatprep.subr.mxu0 %v2629_v1 }
  0x1e   :  { %2309 = vmatprep.subr.mxu1 %v2629_v1  ;;  %2321 = vmatpush3.msra.mxu0 %v2714_v8 }
  0x1f   :  { %2310 = vmatpush3.msra.mxu1 %v2714_v8  ;;  %2322 = vmatprep.subr.mxu0 %v2629_v1 }
  0x20   :  { %2311 = vmatprep.subr.mxu1 %v2629_v1  ;;  %2323 = vmatpush3.msra.mxu0 %v2722_v9 }
  0x21   :  { %2312 = vmatpush3.msra.mxu1 %v2722_v9  ;;  %2338 = vmatprep.subr.mxu0 %v2629_v1 }
  0x22   :  { %2327 = vmatprep.subr.mxu1 %v2629_v1  ;;  %2285 = vmatprep.mubr.msk.f32.mxu0 %vm65_vm1, %v50_v47 }
  0x23   :  { %2286 = vmatmul.mubr.msk.f32.gmra.mxu0 %vm65_vm1, %v51_v48 }
  0x24   :  { %2288 = vmatprep.mubr.msk.f32.mxu0 %vm65_vm1, %v52_v49 }
  0x27   :  { %2289 = vmatmul.mubr.msk.f32.gmra.mxu0 %vm65_vm1, %v53_v50 }
  0x28   :  { %2291 = vmatprep.mubr.msk.f32.mxu0 %vm65_vm1, %v54_v51 }
  0x2b   :  { %2292 = vmatmul.mubr.msk.f32.gmra.mxu0 %vm65_vm1, %v55_v52 }
  0x2c   :  { %2324 = vmatprep.mubr.msk.f32.mxu0 %vm2630_vm0, %v2629_v1 }
  0xd6   :  { %v2284_v10 = vpop.f32.mrf.mxu0 }
  0xd7   :  { %v162_v32 = vadd.f32 %v2284_v10, %v2751_v11 }
  0xd8   :  { %v156_v12 = vpop.f32.mrf.mxu0 }
  0xd9   :  { %v157_v13 = vadd.f32 %v2751_v11, %v156_v12 }
  0xda   :  { %v278_v14 = vpop.f32.mrf.mxu1 }
  0xdb   :  { %v282_v15 = vadd.f32 %v278_v14, %v157_v13 }
  0xdc   :  { %v2304_v16 = vpop.f32.mrf.mxu1 }
  0xdd   :  { %v2114_v17 = vmul.f32 -1.442695, %v282_v15 }
  0xdf   :  { %2508 = vpow2.f32 %v2114_v17 }
  0xe3   :  { %v2287_v57 = vpop.f32.mrf.mxu0 }
  0xe5   :  { %v166_v58 = vpop.f32.mrf.mxu0 }
  0xe6   :  { %v167_v63 = vadd.f32 %v2751_v11, %v166_v58 }
  0xe7   :  { %v2813_v59 = vpop.f32.mrf.mxu0 }
  0xe9   :  { %v2815_v60 = vpop.f32.mrf.mxu0 }
  0xeb   :  { %v2817_v61 = vpop.f32.mrf.mxu0 }
  0xec   :  { %v2509_v18 = vpop.eup %2508 }
  0xed   :  { %v286_v19 = vadd.f32 1.0, %v2509_v18  ;;  %v2819_v62 = vpop.f32.mrf.mxu0 }
  0xef   :  { %2510 = vrcp.f32 %v286_v19 }
  0xfc   :  { %v2511_v20 = vpop.eup %2510 }
  0xfd   :  { %v289_v21 = vmul.f32 2.0, %v2511_v20  ;;  %v291_v25 = vmul.f32 0.0, %v2511_v20 }
  0xff   :  { %v2115_v22 = vadd.f32 -1.0, %v289_v21 }
 0x101   :  { %293 = vrot.lane.b32.xlu0 %v2115_v22, %s2631_s29 }
 0x173   :  { %v294_v23 = vpop.permute.xlu0 %293 }
 0x174   :  { %v296_v24 = vmul.f32 %v2511_v20, %v294_v23 }
 0x176   :  { %298 = vrot.lane.b32.xlu0 %v296_v24, %s2632_s3  ;;  %v172_v24 = vadd.f32 %v2287_v57, %v2751_v11 }
 0x1e8   :  { %v299_v26 = vpop.permute.xlu0 %298 }
 0x1e9   :  { %v301_v27 = vadd.f32 %v299_v26, %v291_v25 }
 0x1eb   :  { %2512 = vtanh.f32 %v301_v27 }
 0x1f8   :  { %v2513_v28 = vpop.eup %2512 }
 0x1f9   :  { %304 = vrot.lane.b32.xlu1 %v2513_v28, %s2631_s29 }
 0x26b   :  { %v305_v29 = vpop.permute.xlu1 %304 }
 0x26c   :  { %v307_v30 = vmul.f32 %v2511_v20, %v305_v29 }
 0x26e   :  { %309 = vrot.lane.b32.xlu1 %v307_v30, %s2632_s3 }
 0x2e0   :  { %v310_v31 = vpop.permute.xlu1 %309 }
 0x2e1   :  { %312 = vst.msk [vmem:[#allocation3] sm:$0xff] %vm208_vm2, %v310_v31  ;;  %2314 = vmatmul.mubr.msk.f32.vlgmr.msra.gmra.mxu1 %vm208_vm2, %v310_v31 }
 0x2e2   :  { %2328 = vmatpush3.msra.mxu1 %v2695_v3  ;;  %2335 = vmatprep.mubr.msk.f32.mxu1 %vm2630_vm0, %v2629_v1 }
 0x2e3   :  { %2329 = vmatprep.subr.mxu1 %v2629_v1 }
 0x2e4   :  { %2330 = vmatpush3.msra.mxu1 %v2701_v5 }
 0x2e5   :  { %2331 = vmatprep.subr.mxu1 %v2629_v1 }
 0x2e6   :  { %2332 = vmatpush3.msra.mxu1 %v2714_v8 }
 0x2e7   :  { %2333 = vmatprep.subr.mxu1 %v2629_v1 }
 0x2e8   :  { %2334 = vmatpush3.msra.mxu1 %v2722_v9 }
 0x2e9   :  { %2349 = vmatprep.subr.mxu1 %v2629_v1 }
 0x3a1   :  { %v382_v33 = vpop.f32.mrf.mxu1 }
 0x3a2   :  { %v386_v34 = vadd.f32 %v382_v33, %v162_v32 }
 0x3a3   :  { %v2315_v35 = vpop.f32.mrf.mxu1 }
 0x3a4   :  { %v2117_v36 = vmul.f32 -1.442695, %v386_v34 }
 0x3a6   :  { %2514 = vpow2.f32 %v2117_v36 }
 0x3b3   :  { %v2515_v37 = vpop.eup %2514 }
 0x3b4   :  { %v390_v38 = vadd.f32 1.0, %v2515_v37 }
 0x3b6   :  { %2516 = vrcp.f32 %v390_v38 }
 0x3c3   :  { %v2517_v39 = vpop.eup %2516 }
 0x3c4   :  { %v393_v40 = vmul.f32 2.0, %v2517_v39  ;;  %v395_v44 = vmul.f32 %v2517_v39, %v301_v27 }
 0x3c6   :  { %v2118_v41 = vadd.f32 -1.0, %v393_v40 }
 0x3c8   :  { %397 = vrot.lane.b32.xlu0 %v2118_v41, %s2631_s29 }
 0x43a   :  { %v398_v42 = vpop.permute.xlu0 %397 }
 0x43b   :  { %v400_v43 = vmul.f32 %v2517_v39, %v398_v42 }
 0x43d   :  { %402 = vrot.lane.b32.xlu1 %v400_v43, %s2632_s3  ;;  %v177_v43 = vadd.f32 %v2751_v11, %v2815_v60 }
 0x4af   :  { %v403_v45 = vpop.permute.xlu1 %402 }
 0x4b0   :  { %v405_v46 = vadd.f32 %v403_v45, %v395_v44 }
 0x4b2   :  { %2518 = vtanh.f32 %v405_v46 }
 0x4bf   :  { %v2519_v53 = vpop.eup %2518 }
 0x4c0   :  { %408 = vrot.lane.b32.xlu0 %v2519_v53, %s2631_s29 }
 0x532   :  { %v409_v54 = vpop.permute.xlu0 %408 }
 0x533   :  { %v411_v55 = vmul.f32 %v2517_v39, %v409_v54 }
 0x535   :  { %413 = vrot.lane.b32.xlu1 %v411_v55, %s2632_s3 }
 0x5a7   :  { %v414_v56 = vpop.permute.xlu1 %413 }
 0x5a8   :  { %416 = vst.msk [vmem:[#allocation3 + $0x8] sm:$0xff] %vm208_vm2, %v414_v56  ;;  %2325 = vmatmul.mubr.msk.f32.vlgmr.msra.gmra.mxu0 %vm208_vm2, %v414_v56 }
 0x5a9   :  { %2339 = vmatpush3.msra.mxu0 %v2695_v3  ;;  %2346 = vmatprep.mubr.msk.f32.mxu0 %vm2630_vm0, %v2629_v1 }
 0x5aa   :  { %2340 = vmatprep.subr.mxu0 %v2629_v1 }
 0x5ab   :  { %2341 = vmatpush3.msra.mxu0 %v2701_v5 }
 0x5ac   :  { %2342 = vmatprep.subr.mxu0 %v2629_v1 }
 0x5ad   :  { %2343 = vmatpush3.msra.mxu0 %v2714_v8 }
 0x5ae   :  { %2344 = vmatprep.subr.mxu0 %v2629_v1 }
 0x5af   :  { %2345 = vmatpush3.msra.mxu0 %v2722_v9 }
 0x5b0   :  { %2360 = vmatprep.subr.mxu0 %v2629_v1 }
 0x668   :  { %v486_v0 = vpop.f32.mrf.mxu0 }
 0x669   :  { %v490_v2 = vadd.f32 %v486_v0, %v167_v63 }
 0x66a   :  { %v2326_v4 = vpop.f32.mrf.mxu0 }
 0x66b   :  { %v2120_v6 = vmul.f32 -1.442695, %v490_v2 }
 0x66d   :  { %2520 = vpow2.f32 %v2120_v6 }
 0x67a   :  { %v2521_v7 = vpop.eup %2520 }
 0x67b   :  { %v494_v10 = vadd.f32 1.0, %v2521_v7 }
 0x67d   :  { %2522 = vrcp.f32 %v494_v10 }
 0x68a   :  { %v2523_v12 = vpop.eup %2522 }
 0x68b   :  { %v497_v13 = vmul.f32 2.0, %v2523_v12  ;;  %v499_v17 = vmul.f32 %v2523_v12, %v405_v46 }
 0x68d   :  { %v2121_v14 = vadd.f32 -1.0, %v497_v13 }
 0x68f   :  { %501 = vrot.lane.b32.xlu0 %v2121_v14, %s2631_s29 }
 0x701   :  { %v502_v15 = vpop.permute.xlu0 %501 }
 0x702   :  { %v504_v16 = vmul.f32 %v2523_v12, %v502_v15 }
 0x704   :  { %506 = vrot.lane.b32.xlu1 %v504_v16, %s2632_s3 }
 0x776   :  { %v507_v18 = vpop.permute.xlu1 %506 }
 0x777   :  { %v509_v19 = vadd.f32 %v507_v18, %v499_v17  ;;  %v1052_v17 = vld [vmem:[%s3112_s4 + $0x18] sm:$0xff] }
 0x779   :  { %2524 = vtanh.f32 %v509_v19 }
 0x786   :  { %v2525_v20 = vpop.eup %2524 }
 0x787   :  { %512 = vrot.lane.b32.xlu0 %v2525_v20, %s2631_s29 }
 0x7f9   :  { %v513_v21 = vpop.permute.xlu0 %512 }
 0x7fa   :  { %v515_v22 = vmul.f32 %v2523_v12, %v513_v21 }
 0x7fc   :  { %517 = vrot.lane.b32.xlu1 %v515_v22, %s2632_s3  ;;  %v1051_v22 = vld [vmem:[%s3112_s4 + $0x10] sm:$0xff] }
 0x86e   :  { %v518_v23 = vpop.permute.xlu1 %517 }
 0x86f   :  { %520 = vst.msk [vmem:[#allocation3 + $0x10] sm:$0xff] %vm208_vm2, %v518_v23  ;;  %2336 = vmatmul.mubr.msk.f32.vlgmr.msra.gmra.mxu1 %vm208_vm2, %v518_v23  ;;  %v1041_v23 = vld [vmem:[#allocation3] sm:$0xff] }
 0x870   :  { %2350 = vmatpush3.msra.mxu1 %v2695_v3  ;;  %2357 = vmatprep.mubr.msk.f32.mxu1 %vm2630_vm0, %v2629_v1 }
 0x871   :  { %2351 = vmatprep.subr.mxu1 %v2629_v1 }
 0x872   :  { %2352 = vmatpush3.msra.mxu1 %v2701_v5 }
 0x873   :  { %2353 = vmatprep.subr.mxu1 %v2629_v1 }
 0x874   :  { %2354 = vmatpush3.msra.mxu1 %v2714_v8 }
 0x875   :  { %2355 = vmatprep.subr.mxu1 %v2629_v1 }
 0x876   :  { %2356 = vmatpush3.msra.mxu1 %v2722_v9 }
 0x877   :  { %2371 = vmatprep.subr.mxu1 %v2629_v1 }
 0x92f   :  { %v590_v25 = vpop.f32.mrf.mxu1 }
 0x930   :  { %v594_v26 = vadd.f32 %v590_v25, %v172_v24  ;;  %v1050_v24 = vld [vmem:[%s3112_s4 + $0x8] sm:$0xff]  ;;  %v1049_v25 = vld [vmem:[%s3112_s4] sm:$0xff] }
 0x931   :  { %v2337_v27 = vpop.f32.mrf.mxu1 }
 0x932   :  { %v2123_v28 = vmul.f32 -1.442695, %v594_v26  ;;  %v1042_v26 = vld [vmem:[#allocation3 + $0x8] sm:$0xff]  ;;  %v1043_v27 = vld [vmem:[#allocation3 + $0x10] sm:$0xff] }
 0x934   :  { %2526 = vpow2.f32 %v2123_v28 }
 0x941   :  { %v2527_v29 = vpop.eup %2526 }
 0x942   :  { %v598_v30 = vadd.f32 1.0, %v2527_v29 }
 0x944   :  { %2528 = vrcp.f32 %v598_v30 }
 0x951   :  { %v2529_v31 = vpop.eup %2528 }
 0x952   :  { %v601_v32 = vmul.f32 2.0, %v2529_v31  ;;  %v603_v36 = vmul.f32 %v2529_v31, %v509_v19 }
 0x954   :  { %v2124_v33 = vadd.f32 -1.0, %v601_v32 }
 0x956   :  { %605 = vrot.lane.b32.xlu0 %v2124_v33, %s2631_s29 }
 0x9c8   :  { %v606_v34 = vpop.permute.xlu0 %605 }
 0x9c9   :  { %v608_v35 = vmul.f32 %v2529_v31, %v606_v34 }
 0x9cb   :  { %610 = vrot.lane.b32.xlu1 %v608_v35, %s2632_s3 }
 0xa3d   :  { %v611_v37 = vpop.permute.xlu1 %610 }
 0xa3e   :  { %v613_v38 = vadd.f32 %v611_v37, %v603_v36 }
 0xa40   :  { %2530 = vtanh.f32 %v613_v38 }
 0xa4d   :  { %v2531_v39 = vpop.eup %2530 }
 0xa4e   :  { %616 = vrot.lane.b32.xlu0 %v2531_v39, %s2631_s29 }
 0xac0   :  { %v617_v40 = vpop.permute.xlu0 %616 }
 0xac1   :  { %v619_v41 = vmul.f32 %v2529_v31, %v617_v40  ;;  %v187_v31 = vadd.f32 %v2751_v11, %v2819_v62 }
 0xac3   :  { %621 = vrot.lane.b32.xlu1 %v619_v41, %s2632_s3 }
 0xb35   :  { %v622_v42 = vpop.permute.xlu1 %621 }
 0xb36   :  { %624 = vst.msk [vmem:[#allocation3 + $0x18] sm:$0xff] %vm208_vm2, %v622_v42  ;;  %2347 = vmatmul.mubr.msk.f32.vlgmr.msra.gmra.mxu0 %vm208_vm2, %v622_v42 }
 0xb37   :  { %2361 = vmatpush3.msra.mxu0 %v2695_v3  ;;  %2368 = vmatprep.mubr.msk.f32.mxu0 %vm2630_vm0, %v2629_v1 }
 0xb38   :  { %2362 = vmatprep.subr.mxu0 %v2629_v1 }
 0xb39   :  { %2363 = vmatpush3.msra.mxu0 %v2701_v5 }
 0xb3a   :  { %2364 = vmatprep.subr.mxu0 %v2629_v1 }
 0xb3b   :  { %2365 = vmatpush3.msra.mxu0 %v2714_v8 }
 0xb3c   :  { %2366 = vmatprep.subr.mxu0 %v2629_v1 }
 0xb3d   :  { %2367 = vmatpush3.msra.mxu0 %v2722_v9  ;;  %v1044_v28 = vld [vmem:[#allocation3 + $0x18] sm:$0xff] }
 0xb3e   :  { %2382 = vmatprep.subr.mxu0 %v1052_v17 }
 0xbf6   :  { %v694_v44 = vpop.f32.mrf.mxu0 }
 0xbf7   :  { %v698_v45 = vadd.f32 %v694_v44, %v177_v43 }
 0xbf8   :  { %v2348_v46 = vpop.f32.mrf.mxu0 }
 0xbf9   :  { %v2126_v47 = vmul.f32 -1.442695, %v698_v45  ;;  %v2910_v46 = vld [vmem:[%s3113_s5 + $0x18] sm:$0xff] }
 0xbfb   :  { %2532 = vpow2.f32 %v2126_v47  ;;  %v2916_v47 = vld [vmem:[%s3113_s5 + $0x10] sm:$0xff] }
 0xc08   :  { %v2533_v48 = vpop.eup %2532 }
 0xc09   :  { %v702_v49 = vadd.f32 1.0, %v2533_v48  ;;  %v2923_v48 = vld [vmem:[%s3113_s5 + $0x8] sm:$0xff] }
 0xc0b   :  { %2534 = vrcp.f32 %v702_v49  ;;  %v2930_v49 = vld [vmem:[%s3113_s5] sm:$0xff] }
 0xc18   :  { %v2535_v50 = vpop.eup %2534 }
 0xc19   :  { %v705_v51 = vmul.f32 2.0, %v2535_v50  ;;  %v707_v55 = vmul.f32 %v2535_v50, %v613_v38 }
 0xc1b   :  { %v2127_v52 = vadd.f32 -1.0, %v705_v51 }
 0xc1d   :  { %709 = vrot.lane.b32.xlu0 %v2127_v52, %s2631_s29 }
 0xc8f   :  { %v710_v53 = vpop.permute.xlu0 %709 }
 0xc90   :  { %v712_v54 = vmul.f32 %v2535_v50, %v710_v53 }
 0xc92   :  { %714 = vrot.lane.b32.xlu1 %v712_v54, %s2632_s3  ;;  %v192_v54 = vadd.f32 %v2817_v61, %v2751_v11 }
 0xd04   :  { %v715_v56 = vpop.permute.xlu1 %714 }
 0xd05   :  { %v717_v57 = vadd.f32 %v715_v56, %v707_v55 }
 0xd07   :  { %2536 = vtanh.f32 %v717_v57 }
 0xd14   :  { %v2537_v58 = vpop.eup %2536 }
 0xd15   :  { %720 = vrot.lane.b32.xlu0 %v2537_v58, %s2631_s29 }
 0xd87   :  { %v721_v60 = vpop.permute.xlu0 %720 }
 0xd88   :  { %v723_v63 = vmul.f32 %v2535_v50, %v721_v60 }
 0xd8a   :  { %725 = vrot.lane.b32.xlu1 %v723_v63, %s2632_s3  ;;  %v2967_v63 = vld [vmem:[%s3114_s6] ss:$0 sm:$0xff] }
 0xdfc   :  { %v726_v0 = vpop.permute.xlu1 %725 }
 0xdfd   :  { %728 = vst.msk [vmem:[#allocation3 + $0x20] sm:$0xff] %vm208_vm2, %v726_v0  ;;  %2358 = vmatmul.mubr.msk.f32.vlgmr.msra.gmra.mxu1 %vm208_vm2, %v726_v0 }
 0xdfe   :  { %2372 = vmatpush3.msra.mxu1 %v2695_v3  ;;  %2379 = vmatprep.mubr.msk.f32.mxu1 %vm2630_vm0, %v2629_v1  ;;  %v182_v3 = vadd.f32 %v2813_v59, %v2751_v11 }
 0xdff   :  { %2373 = vmatprep.subr.mxu1 %v2629_v1 }
 0xe00   :  { %2374 = vmatpush3.msra.mxu1 %v2701_v5 }
 0xe01   :  { %2375 = vmatprep.subr.mxu1 %v2629_v1 }
 0xe02   :  { %2376 = vmatpush3.msra.mxu1 %v2714_v8 }
 0xe03   :  { %2377 = vmatprep.subr.mxu1 %v2629_v1 }
 0xe04   :  { %2378 = vmatpush3.msra.mxu1 %v2722_v9  ;;  %v1045_v29 = vld [vmem:[#allocation3 + $0x20] sm:$0xff] }
 0xe05   :  { %2402 = vmatprep.subr.mxu1 %v2629_v1 }
 0xebd   :  { %v798_v2 = vpop.f32.mrf.mxu1 }
 0xebe   :  { %v802_v4 = vadd.f32 %v798_v2, %v182_v3 }
 0xebf   :  { %v2359_v6 = vpop.f32.mrf.mxu1 }
 0xec0   :  { %v2129_v7 = vmul.f32 -1.442695, %v802_v4 }
 0xec2   :  { %2538 = vpow2.f32 %v2129_v7 }
 0xecf   :  { %v2539_v10 = vpop.eup %2538 }
 0xed0   :  { %v806_v5 = vadd.f32 1.0, %v2539_v10 }
 0xed2   :  { %2540 = vrcp.f32 %v806_v5 }
 0xedf   :  { %v2541_v12 = vpop.eup %2540 }
 0xee0   :  { %v809_v13 = vmul.f32 2.0, %v2541_v12  ;;  %v811_v15 = vmul.f32 %v2541_v12, %v717_v57 }
 0xee2   :  { %v2130_v8 = vadd.f32 -1.0, %v809_v13 }
 0xee4   :  { %813 = vrot.lane.b32.xlu0 %v2130_v8, %s2631_s29 }
 0xf56   :  { %v814_v14 = vpop.permute.xlu0 %813 }
 0xf57   :  { %v816_v9 = vmul.f32 %v2541_v12, %v814_v14 }
 0xf59   :  { %818 = vrot.lane.b32.xlu1 %v816_v9, %s2632_s3 }
 0xfcb   :  { %v819_v16 = vpop.permute.xlu1 %818 }
 0xfcc   :  { %v821_v59 = vadd.f32 %v819_v16, %v811_v15 }
 0xfce   :  { %2542 = vtanh.f32 %v821_v59 }
 0xfdb   :  { %v2543_v18 = vpop.eup %2542 }
 0xfdc   :  { %824 = vrot.lane.b32.xlu0 %v2543_v18, %s2631_s29 }
0x104e   :  { %v825_v19 = vpop.permute.xlu0 %824 }
0x104f   :  { %v827_v20 = vmul.f32 %v2541_v12, %v825_v19 }
0x1051   :  { %829 = vrot.lane.b32.xlu1 %v827_v20, %s2632_s3 }
0x10c3   :  { %v830_v21 = vpop.permute.xlu1 %829 }
0x10c4   :  { %832 = vst.msk [vmem:[#allocation3 + $0x28] sm:$0xff] %vm208_vm2, %v830_v21  ;;  %2369 = vmatmul.mubr.msk.f32.vlgmr.msra.gmra.mxu0 %vm208_vm2, %v830_v21 }
0x10c5   :  { %2383 = vmatpush3.msra.mxu0 %v1052_v17  ;;  %2390 = vmatprep.mubr.msk.f32.mxu0 %vm208_vm2, %v1041_v23 }
0x10c6   :  { %2384 = vmatprep.subr.mxu0 %v1051_v22 }
0x10c7   :  { %2385 = vmatpush3.msra.mxu0 %v1051_v22 }
0x10c8   :  { %2386 = vmatprep.subr.mxu0 %v1050_v24 }
0x10c9   :  { %2387 = vmatpush3.msra.mxu0 %v1050_v24 }
0x10ca   :  { %2388 = vmatprep.subr.mxu0 %v1049_v25 }
0x10cb   :  { %2389 = vmatpush3.msra.mxu0 %v1049_v25  ;;  %v1046_v30 = vld [vmem:[#allocation3 + $0x28] sm:$0xff] }
0x10cc   :  { %2391 = vmatmul.mubr.msk.f32.vlgmr.msra.gmra.mxu0 %vm208_vm2, %v1042_v26  ;;  %2424 = vmatprep.subr.mxu0 %v2629_v1 }
0x10cd   :  { %2393 = vmatprep.mubr.msk.f32.mxu0 %vm208_vm2, %v1043_v27  ;;  %2425 = vmatpush3.msra.mxu0 %v2910_v46 }
0x10ce   :  { %2426 = vmatprep.subr.mxu0 %v2629_v1 }
0x10cf   :  { %2427 = vmatpush3.msra.mxu0 %v2916_v47 }
0x10d0   :  { %2394 = vmatmul.mubr.msk.f32.gmra.mxu0 %vm208_vm2, %v1044_v28  ;;  %2428 = vmatprep.subr.mxu0 %v2629_v1 }
0x10d1   :  { %2396 = vmatprep.mubr.msk.f32.mxu0 %vm208_vm2, %v1045_v29  ;;  %2429 = vmatpush3.msra.mxu0 %v2923_v48 }
0x10d2   :  { %2430 = vmatprep.subr.mxu0 %v2629_v1 }
0x10d3   :  { %2431 = vmatpush3.msra.mxu0 %v2930_v49 }
0x10d4   :  { %2397 = vmatmul.mubr.msk.f32.gmra.mxu0 %vm208_vm2, %v1046_v30  ;;  %2446 = vmatprep.subr.mxu0 %v2629_v1 }
0x1184   :  { %v902_v32 = vpop.f32.mrf.mxu0 }
0x1185   :  { %v906_v33 = vadd.f32 %v902_v32, %v187_v31 }
0x1186   :  { %v2370_v34 = vpop.f32.mrf.mxu0 }
0x1187   :  { %v2132_v35 = vmul.f32 -1.442695, %v906_v33 }
0x1189   :  { %2544 = vpow2.f32 %v2132_v35 }
0x118c   :  { %v2962_v55 = vpop.f32.mrf.mxu0 }
0x118d   :  { %v1156_v32 = vadd.f32 %v2962_v55, %v2967_v63 }
0x118e   :  { %v1150_v60 = vpop.f32.mrf.mxu0 }
0x118f   :  { %v1151_v0 = vadd.f32 %v2967_v63, %v1150_v60 }
0x1196   :  { %v2545_v36 = vpop.eup %2544 }
0x1197   :  { %v910_v37 = vadd.f32 1.0, %v2545_v36 }
0x1199   :  { %2546 = vrcp.f32 %v910_v37 }
0x11a6   :  { %v2547_v38 = vpop.eup %2546 }
0x11a7   :  { %v913_v39 = vmul.f32 2.0, %v2547_v38  ;;  %v915_v43 = vmul.f32 %v2547_v38, %v821_v59 }
0x11a9   :  { %v2133_v40 = vadd.f32 -1.0, %v913_v39 }
0x11ab   :  { %917 = vrot.lane.b32.xlu0 %v2133_v40, %s2631_s29 }
0x121d   :  { %v918_v41 = vpop.permute.xlu0 %917 }
0x121e   :  { %v920_v42 = vmul.f32 %v2547_v38, %v918_v41 }
0x1220   :  { %922 = vrot.lane.b32.xlu1 %v920_v42, %s2632_s3 }
0x1292   :  { %v923_v44 = vpop.permute.xlu1 %922 }
0x1293   :  { %v2903_v62 = vadd.f32 %v923_v44, %v915_v43 }
0x1295   :  { %2548 = vtanh.f32 %v2903_v62 }
0x12a2   :  { %v2549_v45 = vpop.eup %2548 }
0x12a3   :  { %928 = vrot.lane.b32.xlu0 %v2549_v45, %s2631_s29 }
0x1315   :  { %v929_v50 = vpop.permute.xlu0 %928 }
0x1316   :  { %v931_v51 = vmul.f32 %v2547_v38, %v929_v50 }
0x1318   :  { %933 = vrot.lane.b32.xlu1 %v931_v51, %s2632_s3 }
0x138a   :  { %v934_v52 = vpop.permute.xlu1 %933 }
0x138b   :  { %936 = vst.msk [vmem:[#allocation3 + $0x30] sm:$0xff] %vm208_vm2, %v934_v52  ;;  %2380 = vmatmul.mubr.msk.f32.vlgmr.msra.gmra.mxu1 %vm208_vm2, %v934_v52 }
0x138c   :  { %2403 = vmatpush3.msra.mxu1 %v2910_v46  ;;  %2410 = vmatprep.mubr.msk.f32.mxu1 %vm2630_vm0, %v2629_v1 }
0x138d   :  { %2404 = vmatprep.subr.mxu1 %v2629_v1 }
0x138e   :  { %2405 = vmatpush3.msra.mxu1 %v2916_v47 }
0x138f   :  { %2406 = vmatprep.subr.mxu1 %v2629_v1 }
0x1390   :  { %2407 = vmatpush3.msra.mxu1 %v2923_v48 }
0x1391   :  { %2408 = vmatprep.subr.mxu1 %v2629_v1 }
0x1392   :  { %2409 = vmatpush3.msra.mxu1 %v2930_v49  ;;  %v1047_v53 = vld [vmem:[#allocation3 + $0x30] sm:$0xff] }
0x1393   :  { %2411 = vmatmul.mubr.f32.vlgmr.msra.gmra.mxu1 %v2629_v1  ;;  %2399 = vmatprep.mubr.msk.f32.mxu0 %vm208_vm2, %v1047_v53 }
0x1394   :  { %2413 = vmatprep.subr.mxu1 %v2629_v1  ;;  %2421 = vmatprep.mubr.msk.f32.mxu1 %vm2630_vm0, %v2629_v1 }
0x1395   :  { %2414 = vmatpush3.msra.mxu1 %v2910_v46 }
0x1396   :  { %2415 = vmatprep.subr.mxu1 %v2629_v1 }
0x1397   :  { %2416 = vmatpush3.msra.mxu1 %v2916_v47 }
0x1398   :  { %2417 = vmatprep.subr.mxu1 %v2629_v1 }
0x1399   :  { %2418 = vmatpush3.msra.mxu1 %v2923_v48 }
0x139a   :  { %2419 = vmatprep.subr.mxu1 %v2629_v1 }
0x139b   :  { %2420 = vmatpush3.msra.mxu1 %v2930_v49 }
0x139c   :  { %2435 = vmatprep.subr.mxu1 %v2629_v1 }
0x144b   :  { %v1006_v56 = vpop.f32.mrf.mxu1 }
0x144c   :  { %v1010_v57 = vadd.f32 %v1006_v56, %v192_v54  ;;  %v2395_v56 = vpop.f32.mrf.mxu0 }
0x144d   :  { %v2381_v58 = vpop.f32.mrf.mxu1 }
0x144e   :  { %v2135_v8 = vmul.f32 -1.442695, %v1010_v57  ;;  %v1160_v57 = vpop.f32.mrf.mxu0 }
0x1450   :  { %v3011_v58 = vpop.f32.mrf.mxu0 }
0x1452   :  { %v3013_v60 = vpop.f32.mrf.mxu0 }
0x1453   :  { %v1268_v3 = vpop.f32.mrf.mxu1 }
0x1454   :  { %v1272_v2 = vadd.f32 %v1268_v3, %v1151_v0 }
0x1455   :  { %v2412_v4 = vpop.f32.mrf.mxu1 }
0x1456   :  { %v2146_v6 = vmul.f32 -1.442695, %v1272_v2  ;;  %v1161_v2 = vadd.f32 %v2967_v63, %v1160_v57 }
0x1458   :  { %2550 = vpow2.f32 %v2146_v6 }
0x1465   :  { %v2551_v7 = vpop.eup %2550 }
0x1466   :  { %v1276_v11 = vadd.f32 1.0, %v2551_v7 }
0x1468   :  { %2552 = vrcp.f32 %v1276_v11 }
0x1469   :  { %2554 = vpow2.f32 %v2135_v8 }
0x1475   :  { %v2553_v61 = vpop.eup %2552 }
0x1476   :  { %v1279_v10 = vmul.f32 2.0, %v2553_v61  ;;  %v2555_v14 = vpop.eup %2554  ;;  %v1281_v15 = vmul.f32 0.0, %v2553_v61 }
0x1477   :  { %v1014_v9 = vadd.f32 1.0, %v2555_v14 }
0x1478   :  { %v2147_v5 = vadd.f32 -1.0, %v1279_v10 }
0x1479   :  { %2556 = vrcp.f32 %v1014_v9 }
0x147a   :  { %1283 = vrot.lane.b32.xlu0 %v2147_v5, %s2631_s29 }
0x1486   :  { %v2557_v17 = vpop.eup %2556 }
0x1487   :  { %v1017_v18 = vmul.f32 2.0, %v2557_v17  ;;  %v1019_v26 = vmul.f32 %v2557_v17, %v2903_v62 }
0x1489   :  { %v2136_v20 = vadd.f32 -1.0, %v1017_v18 }
0x14ec   :  { %v1284_v12 = vpop.permute.xlu0 %1283 }
0x14ed   :  { %v1286_v13 = vmul.f32 %v2553_v61, %v1284_v12 }
0x14ef   :  { %1288 = vrot.lane.b32.xlu1 %v1286_v13, %s2632_s3 }
0x1561   :  { %v1289_v16 = vpop.permute.xlu1 %1288 }
0x1562   :  { %v1291_v59 = vadd.f32 %v1289_v16, %v1281_v15 }
0x1564   :  { %2558 = vtanh.f32 %v1291_v59 }
0x1571   :  { %v2559_v19 = vpop.eup %2558 }
0x1572   :  { %1294 = vrot.lane.b32.xlu0 %v2559_v19, %s2631_s29 }
0x1576   :  { %1021 = vrot.lane.b32.xlu0 %v2136_v20, %s2631_s29  ;;  %v1166_v20 = vadd.f32 %v2395_v56, %v2967_v63 }
0x15e4   :  { %v1295_v21 = vpop.permute.xlu0 %1294 }
0x15e5   :  { %v1297_v22 = vmul.f32 %v2553_v61, %v1295_v21 }
0x15e7   :  { %1300 = vrot.lane.b32.xlu1 %v1297_v22, %s2632_s3 }
0x15e8   :  { %v1022_v23 = vpop.permute.xlu0 %1021 }
0x15e9   :  { %v1024_v24 = vmul.f32 %v2557_v17, %v1022_v23 }
0x15eb   :  { %1026 = vrot.lane.b32.xlu0 %v1024_v24, %s2632_s3 }
0x1659   :  { %v1301_v25 = vpop.permute.xlu1 %1300 }
0x165a   :  { %2422 = vmatmul.mubr.msk.f32.vlgmr.msra.gmra.mxu1 %vm208_vm2, %v1301_v25 }
0x165b   :  { %2436 = vmatpush3.msra.mxu1 %v2910_v46  ;;  %2443 = vmatprep.mubr.msk.f32.mxu1 %vm2630_vm0, %v2629_v1 }
0x165c   :  { %2437 = vmatprep.subr.mxu1 %v2629_v1 }
0x165d   :  { %v1027_v27 = vpop.permute.xlu0 %1026  ;;  %2438 = vmatpush3.msra.mxu1 %v2916_v47 }
0x165e   :  { %v1029_v28 = vadd.f32 %v1027_v27, %v1019_v26  ;;  %2439 = vmatprep.subr.mxu1 %v2629_v1 }
0x165f   :  { %2440 = vmatpush3.msra.mxu1 %v2923_v48 }
0x1660   :  { %2560 = vtanh.f32 %v1029_v28  ;;  %2441 = vmatprep.subr.mxu1 %v2629_v1 }
0x1661   :  { %2442 = vmatpush3.msra.mxu1 %v2930_v49 }
0x1662   :  { %2457 = vmatprep.subr.mxu1 %v2629_v1 }
0x166d   :  { %v2561_v29 = vpop.eup %2560 }
0x166e   :  { %1032 = vrot.lane.b32.xlu0 %v2561_v29, %s2631_s29 }
0x16e0   :  { %v1033_v30 = vpop.permute.xlu0 %1032 }
0x16e1   :  { %v1035_v31 = vmul.f32 %v2557_v17, %v1033_v30 }
0x16e3   :  { %1037 = vrot.lane.b32.xlu0 %v1035_v31, %s2632_s3 }
0x171a   :  { %v1370_v33 = vpop.f32.mrf.mxu1 }
0x171b   :  { %v1374_v34 = vadd.f32 %v1370_v33, %v1156_v32 }
0x171c   :  { %v2423_v35 = vpop.f32.mrf.mxu1 }
0x171d   :  { %v2149_v36 = vmul.f32 -1.442695, %v1374_v34 }
0x171f   :  { %2562 = vpow2.f32 %v2149_v36 }
0x172c   :  { %v2563_v37 = vpop.eup %2562 }
0x172d   :  { %v1378_v38 = vadd.f32 1.0, %v2563_v37 }
0x172f   :  { %2564 = vrcp.f32 %v1378_v38 }
0x173c   :  { %v2565_v39 = vpop.eup %2564 }
0x173d   :  { %v1381_v40 = vmul.f32 2.0, %v2565_v39  ;;  %v1383_v45 = vmul.f32 %v2565_v39, %v1291_v59 }
0x173f   :  { %v2150_v41 = vadd.f32 -1.0, %v1381_v40 }
0x1741   :  { %1385 = vrot.lane.b32.xlu1 %v2150_v41, %s2631_s29 }
0x1755   :  { %v1038_v42 = vpop.permute.xlu0 %1037 }
0x1756   :  { %1040 = vst.msk [vmem:[#allocation3 + $0x38] sm:$0xff] %vm208_vm2, %v1038_v42 }
0x175d   :  { %v1048_v43 = vld [vmem:[#allocation3 + $0x38] sm:$0xff] }
0x175e   :  { %2400 = vmatmul.mubr.msk.f32.gmra.mxu0 %vm208_vm2, %v1048_v43 }
0x175f   :  { %2432 = vmatprep.mubr.msk.f32.mxu0 %vm2630_vm0, %v2629_v1 }
0x17b3   :  { %v1386_v44 = vpop.permute.xlu1 %1385 }
0x17b4   :  { %v1388_v62 = vmul.f32 %v2565_v39, %v1386_v44 }
0x17b6   :  { %1390 = vrot.lane.b32.xlu1 %v1388_v62, %s2632_s3 }
0x181e   :  { %v3015_v0 = vpop.f32.mrf.mxu0 }
0x1820   :  { %v3017_v3 = vpop.f32.mrf.mxu0 }
0x1828   :  { %v1391_v50 = vpop.permute.xlu1 %1390 }
0x1829   :  { %v1393_v51 = vadd.f32 %v1391_v50, %v1383_v45 }
0x182b   :  { %2566 = vtanh.f32 %v1393_v51 }
0x1838   :  { %v2567_v52 = vpop.eup %2566 }
0x1839   :  { %1396 = vrot.lane.b32.xlu1 %v2567_v52, %s2631_s29 }
0x18ab   :  { %v1397_v53 = vpop.permute.xlu1 %1396 }
0x18ac   :  { %v1399_v54 = vmul.f32 %v2565_v39, %v1397_v53  ;;  %v1171_v39 = vadd.f32 %v2967_v63, %v3013_v60 }
0x18ae   :  { %1402 = vrot.lane.b32.xlu1 %v1399_v54, %s2632_s3 }
0x1920   :  { %v1403_v55 = vpop.permute.xlu1 %1402 }
0x1921   :  { %2433 = vmatmul.mubr.msk.f32.vlgmr.msra.gmra.mxu0 %vm208_vm2, %v1403_v55 }
0x1922   :  { %2447 = vmatpush3.msra.mxu0 %v2910_v46  ;;  %2454 = vmatprep.mubr.msk.f32.mxu0 %vm2630_vm0, %v2629_v1 }
0x1923   :  { %2448 = vmatprep.subr.mxu0 %v2629_v1 }
0x1924   :  { %2449 = vmatpush3.msra.mxu0 %v2916_v47 }
0x1925   :  { %2450 = vmatprep.subr.mxu0 %v2629_v1 }
0x1926   :  { %2451 = vmatpush3.msra.mxu0 %v2923_v48 }
0x1927   :  { %2452 = vmatprep.subr.mxu0 %v2629_v1 }
0x1928   :  { %2453 = vmatpush3.msra.mxu0 %v2930_v49 }
0x1929   :  { %2468 = vmatprep.subr.mxu0 %v2629_v1 }
0x19e1   :  { %v1472_v4 = vpop.f32.mrf.mxu0 }
0x19e2   :  { %v1476_v6 = vadd.f32 %v1472_v4, %v1161_v2 }
0x19e3   :  { %v2434_v7 = vpop.f32.mrf.mxu0 }
0x19e4   :  { %v2152_v11 = vmul.f32 -1.442695, %v1476_v6  ;;  %v1176_v6 = vadd.f32 %v3011_v58, %v2967_v63 }
0x19e6   :  { %2568 = vpow2.f32 %v2152_v11 }
0x19f3   :  { %v2569_v61 = vpop.eup %2568 }
0x19f4   :  { %v1480_v10 = vadd.f32 1.0, %v2569_v61 }
0x19f6   :  { %2570 = vrcp.f32 %v1480_v10 }
0x1a03   :  { %v2571_v5 = vpop.eup %2570 }
0x1a04   :  { %v1483_v12 = vmul.f32 2.0, %v2571_v5  ;;  %v1485_v9 = vmul.f32 %v2571_v5, %v1393_v51 }
0x1a06   :  { %v2153_v13 = vadd.f32 -1.0, %v1483_v12 }
0x1a08   :  { %1487 = vrot.lane.b32.xlu0 %v2153_v13, %s2631_s29 }
0x1a7a   :  { %v1488_v8 = vpop.permute.xlu0 %1487 }
0x1a7b   :  { %v1490_v14 = vmul.f32 %v2571_v5, %v1488_v8 }
0x1a7d   :  { %1492 = vrot.lane.b32.xlu1 %v1490_v14, %s2632_s3 }
0x1aef   :  { %v1493_v15 = vpop.permute.xlu1 %1492 }
0x1af0   :  { %v1495_v16 = vadd.f32 %v1493_v15, %v1485_v9 }
0x1af2   :  { %2572 = vtanh.f32 %v1495_v16 }
0x1aff   :  { %v2573_v59 = vpop.eup %2572 }
0x1b00   :  { %1498 = vrot.lane.b32.xlu0 %v2573_v59, %s2631_s29 }
0x1b72   :  { %v1499_v17 = vpop.permute.xlu0 %1498 }
0x1b73   :  { %v1501_v18 = vmul.f32 %v2571_v5, %v1499_v17  ;;  %v1181_v17 = vadd.f32 %v2967_v63, %v3017_v3 }
0x1b75   :  { %1504 = vrot.lane.b32.xlu1 %v1501_v18, %s2632_s3 }
0x1be7   :  { %v1505_v19 = vpop.permute.xlu1 %1504 }
0x1be8   :  { %2444 = vmatmul.mubr.msk.f32.vlgmr.msra.gmra.mxu1 %vm208_vm2, %v1505_v19 }
0x1be9   :  { %2458 = vmatpush3.msra.mxu1 %v2910_v46  ;;  %2465 = vmatprep.mubr.msk.f32.mxu1 %vm2630_vm0, %v2629_v1 }
0x1bea   :  { %2459 = vmatprep.subr.mxu1 %v2629_v1 }
0x1beb   :  { %2460 = vmatpush3.msra.mxu1 %v2916_v47 }
0x1bec   :  { %2461 = vmatprep.subr.mxu1 %v2629_v1 }
0x1bed   :  { %2462 = vmatpush3.msra.mxu1 %v2923_v48 }
0x1bee   :  { %2463 = vmatprep.subr.mxu1 %v2629_v1 }
0x1bef   :  { %2464 = vmatpush3.msra.mxu1 %v2930_v49 }
0x1bf0   :  { %2479 = vmatprep.subr.mxu1 %v2629_v1 }
0x1ca8   :  { %v1574_v21 = vpop.f32.mrf.mxu1 }
0x1ca9   :  { %v1578_v22 = vadd.f32 %v1574_v21, %v1166_v20 }
0x1caa   :  { %v2445_v23 = vpop.f32.mrf.mxu1 }
0x1cab   :  { %v2155_v24 = vmul.f32 -1.442695, %v1578_v22 }
0x1cad   :  { %2574 = vpow2.f32 %v2155_v24 }
0x1cba   :  { %v2575_v25 = vpop.eup %2574 }
0x1cbb   :  { %v1582_v26 = vadd.f32 1.0, %v2575_v25 }
0x1cbd   :  { %2576 = vrcp.f32 %v1582_v26 }
0x1cca   :  { %v2577_v27 = vpop.eup %2576 }
0x1ccb   :  { %v1585_v28 = vmul.f32 2.0, %v2577_v27  ;;  %v1587_v32 = vmul.f32 %v2577_v27, %v1495_v16 }
0x1ccd   :  { %v2156_v29 = vadd.f32 -1.0, %v1585_v28 }
0x1ccf   :  { %1589 = vrot.lane.b32.xlu0 %v2156_v29, %s2631_s29 }
0x1d41   :  { %v1590_v30 = vpop.permute.xlu0 %1589 }
0x1d42   :  { %v1592_v31 = vmul.f32 %v2577_v27, %v1590_v30 }
0x1d44   :  { %1594 = vrot.lane.b32.xlu1 %v1592_v31, %s2632_s3 }
0x1db6   :  { %v1595_v33 = vpop.permute.xlu1 %1594 }
0x1db7   :  { %v1597_v34 = vadd.f32 %v1595_v33, %v1587_v32 }
0x1db9   :  { %2578 = vtanh.f32 %v1597_v34 }
0x1dc6   :  { %v2579_v35 = vpop.eup %2578 }
0x1dc7   :  { %1600 = vrot.lane.b32.xlu0 %v2579_v35, %s2631_s29  ;;  %v1186_v35 = vadd.f32 %v3015_v0, %v2967_v63  ;;  %v2015_v0 = vld [vmem:[%s3115_s7 + $0x18] sm:$0xff] }
0x1e39   :  { %v1601_v36 = vpop.permute.xlu0 %1600 }
0x1e3a   :  { %v1603_v37 = vmul.f32 %v2577_v27, %v1601_v36 }
0x1e3c   :  { %1606 = vrot.lane.b32.xlu1 %v1603_v37, %s2632_s3 }
0x1eae   :  { %v1607_v38 = vpop.permute.xlu1 %1606 }
0x1eaf   :  { %2455 = vmatmul.mubr.msk.f32.vlgmr.msra.gmra.mxu0 %vm208_vm2, %v1607_v38 }
0x1eb0   :  { %2469 = vmatpush3.msra.mxu0 %v2910_v46  ;;  %2476 = vmatprep.mubr.msk.f32.mxu0 %vm2630_vm0, %v2629_v1 }
0x1eb1   :  { %2470 = vmatprep.subr.mxu0 %v2629_v1 }
0x1eb2   :  { %2471 = vmatpush3.msra.mxu0 %v2916_v47 }
0x1eb3   :  { %2472 = vmatprep.subr.mxu0 %v2629_v1 }
0x1eb4   :  { %2473 = vmatpush3.msra.mxu0 %v2923_v48 }
0x1eb5   :  { %2474 = vmatprep.subr.mxu0 %v2629_v1 }
0x1eb6   :  { %2475 = vmatpush3.msra.mxu0 %v2930_v49 }
0x1eb7   :  { %2490 = vmatprep.subr.mxu0 %v2629_v1 }
0x1f6f   :  { %v1676_v40 = vpop.f32.mrf.mxu0 }
0x1f70   :  { %v1680_v41 = vadd.f32 %v1676_v40, %v1171_v39 }
0x1f71   :  { %v2456_v42 = vpop.f32.mrf.mxu0 }
0x1f72   :  { %v2158_v43 = vmul.f32 -1.442695, %v1680_v41 }
0x1f74   :  { %2580 = vpow2.f32 %v2158_v43 }
0x1f81   :  { %v2581_v44 = vpop.eup %2580 }
0x1f82   :  { %v1684_v62 = vadd.f32 1.0, %v2581_v44 }
0x1f84   :  { %2582 = vrcp.f32 %v1684_v62 }
0x1f91   :  { %v2583_v45 = vpop.eup %2582 }
0x1f92   :  { %v1687_v50 = vmul.f32 2.0, %v2583_v45  ;;  %v1689_v54 = vmul.f32 %v2583_v45, %v1597_v34 }
0x1f94   :  { %v2159_v51 = vadd.f32 -1.0, %v1687_v50 }
0x1f96   :  { %1691 = vrot.lane.b32.xlu0 %v2159_v51, %s2631_s29 }
0x2008   :  { %v1692_v52 = vpop.permute.xlu0 %1691 }
0x2009   :  { %v1694_v53 = vmul.f32 %v2583_v45, %v1692_v52  ;;  %v2014_v52 = vld [vmem:[%s3115_s7 + $0x10] sm:$0xff] }
0x200b   :  { %1696 = vrot.lane.b32.xlu1 %v1694_v53, %s2632_s3  ;;  %v2013_v53 = vld [vmem:[%s3115_s7 + $0x8] sm:$0xff] }
0x207d   :  { %v1697_v55 = vpop.permute.xlu1 %1696 }
0x207e   :  { %v1699_v56 = vadd.f32 %v1697_v55, %v1689_v54  ;;  %v2012_v54 = vld [vmem:[%s3115_s7] sm:$0xff] }
0x2080   :  { %2584 = vtanh.f32 %v1699_v56 }
0x208d   :  { %v2585_v57 = vpop.eup %2584 }
0x208e   :  { %1702 = vrot.lane.b32.xlu0 %v2585_v57, %s2631_s29 }
0x2100   :  { %v1703_v60 = vpop.permute.xlu0 %1702 }
0x2101   :  { %v1705_v2 = vmul.f32 %v2583_v45, %v1703_v60 }
0x2103   :  { %1708 = vrot.lane.b32.xlu1 %v1705_v2, %s2632_s3  ;;  %v2169_v2 = vld [vmem:[#allocation4] ss:$0 sm:$0xff] }
0x2175   :  { %v1709_v4 = vpop.permute.xlu1 %1708 }
0x2176   :  { %2466 = vmatmul.mubr.msk.f32.vlgmr.msra.gmra.mxu1 %vm208_vm2, %v1709_v4 }
0x2177   :  { %2480 = vmatpush3.msra.mxu1 %v2910_v46  ;;  %2487 = vmatprep.mubr.msk.f32.mxu1 %vm2630_vm0, %v2629_v1 }
0x2178   :  { %2481 = vmatprep.subr.mxu1 %v2629_v1 }
0x2179   :  { %2482 = vmatpush3.msra.mxu1 %v2916_v47 }
0x217a   :  { %2483 = vmatprep.subr.mxu1 %v2629_v1 }
0x217b   :  { %2484 = vmatpush3.msra.mxu1 %v2923_v48 }
0x217c   :  { %2485 = vmatprep.subr.mxu1 %v2629_v1 }
0x217d   :  { %2486 = vmatpush3.msra.mxu1 %v2930_v49 }
0x2236   :  { %v1778_v7 = vpop.f32.mrf.mxu1 }
0x2237   :  { %v1782_v46 = vadd.f32 %v1778_v7, %v1176_v6 }
0x2238   :  { %v2467_v11 = vpop.f32.mrf.mxu1 }
0x2239   :  { %v2161_v61 = vmul.f32 -1.442695, %v1782_v46 }
0x223b   :  { %2586 = vpow2.f32 %v2161_v61 }
0x2248   :  { %v2587_v10 = vpop.eup %2586 }
0x2249   :  { %v1786_v5 = vadd.f32 1.0, %v2587_v10 }
0x224b   :  { %2588 = vrcp.f32 %v1786_v5 }
0x2258   :  { %v2589_v47 = vpop.eup %2588 }
0x2259   :  { %v1789_v12 = vmul.f32 2.0, %v2589_v47  ;;  %v1791_v49 = vmul.f32 %v2589_v47, %v1699_v56 }
0x225b   :  { %v2162_v13 = vadd.f32 -1.0, %v1789_v12 }
0x225d   :  { %1793 = vrot.lane.b32.xlu0 %v2162_v13, %s2631_s29 }
0x22cf   :  { %v1794_v48 = vpop.permute.xlu0 %1793 }
0x22d0   :  { %v1796_v8 = vmul.f32 %v2589_v47, %v1794_v48 }
0x22d2   :  { %1798 = vrot.lane.b32.xlu1 %v1796_v8, %s2632_s3 }
0x2344   :  { %v1799_v14 = vpop.permute.xlu1 %1798 }
0x2345   :  { %v1801_v58 = vadd.f32 %v1799_v14, %v1791_v49 }
0x2347   :  { %2590 = vtanh.f32 %v1801_v58 }
0x2354   :  { %v2591_v9 = vpop.eup %2590 }
0x2355   :  { %1804 = vrot.lane.b32.xlu0 %v2591_v9, %s2631_s29 }
0x23c7   :  { %v1805_v15 = vpop.permute.xlu0 %1804 }
0x23c8   :  { %v1807_v16 = vmul.f32 %v2589_v47, %v1805_v15 }
0x23ca   :  { %1810 = vrot.lane.b32.xlu1 %v1807_v16, %s2632_s3 }
0x243c   :  { %v1811_v59 = vpop.permute.xlu1 %1810 }
0x243d   :  { %2477 = vmatmul.mubr.msk.f32.vlgmr.msra.gmra.mxu0 %vm208_vm2, %v1811_v59 }
0x243e   :  { %2498 = vmatprep.mubr.msk.f32.mxu0 %vm2630_vm0, %v2629_v1  ;;  %2491 = vmatpush3.msra.mxu0 %v2015_v0 }
0x243f   :  { %2492 = vmatprep.subr.mxu0 %v2629_v1 }
0x2440   :  { %2493 = vmatpush3.msra.mxu0 %v2014_v52 }
0x2441   :  { %2494 = vmatprep.subr.mxu0 %v2629_v1 }
0x2442   :  { %2495 = vmatpush3.msra.mxu0 %v2013_v53 }
0x2443   :  { %2496 = vmatprep.subr.mxu0 %v2629_v1 }
0x2444   :  { %2497 = vmatpush3.msra.mxu0 %v2012_v54 }
0x24fd   :  { %v1880_v18 = vpop.f32.mrf.mxu0 }
0x24fe   :  { %v1884_v19 = vadd.f32 %v1880_v18, %v1181_v17 }
0x24ff   :  { %v2478_v20 = vpop.f32.mrf.mxu0 }
0x2500   :  { %v2164_v21 = vmul.f32 -1.442695, %v1884_v19 }
0x2502   :  { %2592 = vpow2.f32 %v2164_v21 }
0x250f   :  { %v2593_v22 = vpop.eup %2592 }
0x2510   :  { %v1888_v23 = vadd.f32 1.0, %v2593_v22 }
0x2512   :  { %2594 = vrcp.f32 %v1888_v23 }
0x251f   :  { %v2595_v24 = vpop.eup %2594 }
0x2520   :  { %v1891_v25 = vmul.f32 2.0, %v2595_v24  ;;  %v1893_v29 = vmul.f32 %v2595_v24, %v1801_v58 }
0x2522   :  { %v2165_v26 = vadd.f32 -1.0, %v1891_v25 }
0x2524   :  { %1895 = vrot.lane.b32.xlu0 %v2165_v26, %s2631_s29 }
0x2596   :  { %v1896_v27 = vpop.permute.xlu0 %1895 }
0x2597   :  { %v1898_v28 = vmul.f32 %v2595_v24, %v1896_v27 }
0x2599   :  { %1900 = vrot.lane.b32.xlu1 %v1898_v28, %s2632_s3 }
0x260b   :  { %v1901_v30 = vpop.permute.xlu1 %1900 }
0x260c   :  { %v1903_v3 = vadd.f32 %v1901_v30, %v1893_v29 }
0x260e   :  { %2596 = vtanh.f32 %v1903_v3 }
0x261b   :  { %v2597_v31 = vpop.eup %2596 }
0x261c   :  { %1906 = vrot.lane.b32.xlu0 %v2597_v31, %s2631_s29 }
0x268e   :  { %v1907_v32 = vpop.permute.xlu0 %1906 }
0x268f   :  { %v1909_v33 = vmul.f32 %v2595_v24, %v1907_v32 }
0x2691   :  { %1912 = vrot.lane.b32.xlu1 %v1909_v33, %s2632_s3 }
0x2703   :  { %v1913_v34 = vpop.permute.xlu1 %1912 }
0x2704   :  { %2488 = vmatmul.mubr.msk.f32.vlgmr.msra.gmra.mxu1 %vm208_vm2, %v1913_v34 }
0x27c4   :  { %v1982_v36 = vpop.f32.mrf.mxu1 }
0x27c5   :  { %v1986_v37 = vadd.f32 %v1982_v36, %v1186_v35 }
0x27c6   :  { %v2489_v38 = vpop.f32.mrf.mxu1 }
0x27c7   :  { %v2167_v39 = vmul.f32 -1.442695, %v1986_v37 }
0x27c9   :  { %2598 = vpow2.f32 %v2167_v39 }
0x27d6   :  { %v2599_v40 = vpop.eup %2598 }
0x27d7   :  { %v1990_v41 = vadd.f32 1.0, %v2599_v40 }
0x27d9   :  { %2600 = vrcp.f32 %v1990_v41 }
0x27e6   :  { %v2601_v42 = vpop.eup %2600 }
0x27e7   :  { %v1993_v43 = vmul.f32 2.0, %v2601_v42  ;;  %v1995_v50 = vmul.f32 %v2601_v42, %v1903_v3 }
0x27e9   :  { %v2168_v44 = vadd.f32 -1.0, %v1993_v43 }
0x27eb   :  { %1997 = vrot.lane.b32.xlu0 %v2168_v44, %s2631_s29 }
0x285d   :  { %v1998_v62 = vpop.permute.xlu0 %1997 }
0x285e   :  { %v2000_v45 = vmul.f32 %v2601_v42, %v1998_v62 }
0x2860   :  { %2002 = vrot.lane.b32.xlu1 %v2000_v45, %s2632_s3 }
0x28d2   :  { %v2003_v51 = vpop.permute.xlu1 %2002 }
0x28d3   :  { %v2005_v63 = vadd.f32 %v2003_v51, %v1995_v50 }
0x28d5   :  { %2602 = vtanh.f32 %v2005_v63 }
0x28e2   :  { %v2603_v55 = vpop.eup %2602 }
0x28e3   :  { %2008 = vrot.lane.b32.xlu0 %v2603_v55, %s2631_s29 }
0x2955   :  { %v2009_v56 = vpop.permute.xlu0 %2008 }
0x2956   :  { %v2011_v57 = vmul.f32 %v2601_v42, %v2009_v56 }
0x2958   :  { %2024 = vrot.lane.b32.xlu1 %v2011_v57, %s2632_s3 }
0x29ca   :  { %v2025_v60 = vpop.permute.xlu1 %2024 }
0x29cb   :  { %2499 = vmatmul.mubr.msk.f32.vlgmr.msra.gmra.mxu0 %vm208_vm2, %v2025_v60 }
0x2a8b   :  { %v2094_v4 = vpop.f32.mrf.mxu0 }
0x2a8c   :  { %v2095_v6 = vadd.f32 %v2169_v2, %v2094_v4 }
0x2a8d   :  { %v2500_v7 = vpop.f32.mrf.mxu0 }
0x2a8e   :  { %2099 = vst.msk [vmem:[%s3117_s9] sm:$0xff] %vm2098_vm3, %v2095_v6 }
0x2a8f   :  { %2104 = vsyncpa [#allocation6], 1 }

</bundles_post_ra>
